<compile_context>
chip_gen: v5e
topology: v5e:2x2
jax: 0.10.0
libtpu: 0.0.40
codegen_flags: <defaults>
</compile_context>

<pallas_src>
import jax
import jax.numpy as jnp
from jax.experimental import pallas as pl
from jax.experimental.pallas import tpu as pltpu

# ---------------- configuration (small synthetic shapes) ----------------
BATCH = 2
SEQ = 16            # two time-chunks -> exercises the cross-chunk (h, c) carry
EMB = 32            # emb_size
HIDDEN = 32         # hidden_size
NUM_CLS = 10        # num_object_class
# use_bidir=False, num_layers=1, use_lang_classifier=True, no BERT.


def lstm_lang_kernel(x_ref, len_ref, wih_ref, whh_ref, b_ref, wcls_ref, bcls_ref,
                     out_ref, emb_ref, scores_ref,
                     gx_ref, hstage_ref, h_ref, c_ref):
    """One (batch-chunk, time-chunk) grid step of the packed-LSTM forward.

    x_ref:      [BC, TC, E]  f32   batch-first input slab
    len_ref:    [BC, 1]      i32   sequence lengths
    wih_ref:    [E, 4H]      bf16  (transposed: gates_x = x @ wih)
    whh_ref:    [H, 4H]      bf16
    b_ref:      [1, 4H]      f32   (b_ih + b_hh combined)
    wcls_ref:   [H, C]       bf16
    bcls_ref:   [1, C]       f32
    out_ref:    [BC, TC, H]  f32   LSTM outputs (zero past each length)
    emb_ref:    [BC, H]      f32   h_{len-1}   (revisited block across the T axis)
    scores_ref: [BC, C]      f32   classifier  (revisited block across the T axis)
    gx_ref:     [TC, BC, 4H] f32   scratch: hoisted per-chunk input projection
    hstage_ref: [TC, BC, H]  f32   scratch: per-step h, bulk-stored once per chunk
    h_ref/c_ref:[BC, H]      f32   scratch: state carried across the T chunks
    """
    TC, BC, H = hstage_ref.shape
    t_chunk = pl.program_id(1)
    n_tchunks = pl.num_programs(1)

    @pl.when(t_chunk == 0)
    def _():
        h_ref[...] = jnp.zeros_like(h_ref)
        c_ref[...] = jnp.zeros_like(c_ref)

    lens = len_ref[...]                               # (BC, 1) i32, hoisted
    t0 = t_chunk * TC

    # Hoisted per-chunk input projection: one lane-dense bf16 MXU call covering all
    # TC steps, bias folded in, stored time-major so per-step reads are leading-axis
    # (tile-aligned), off the serial recurrence chain.
    x_tb = jnp.transpose(x_ref[...], (1, 0, 2)).astype(jnp.bfloat16)   # (TC, BC, E)
    gx_ref[...] = (
        jax.lax.dot_general(x_tb, wih_ref[...],
                            dimension_numbers=(((2,), (0,)), ((), ())),
                            preferred_element_type=jnp.float32)
        + b_ref[...][None])                           # (TC, BC, 4H) f32

    whh = whh_ref[...]                                # (H, 4H) bf16, hoisted

    def step(t, carry):
        h, c = carry                                  # (BC, H) f32 each
        gates = gx_ref[t] + jnp.dot(h.astype(jnp.bfloat16), whh,
                                    preferred_element_type=jnp.float32)
        # PyTorch LSTM gate order: i, f, g, o.  Sliced activations: 3H of sigmoid +
        # H of tanh (not 4H of each) -> half the EUP traffic at production H.
        i_g = jax.nn.sigmoid(gates[:, 0:H])
        f_g = jax.nn.sigmoid(gates[:, H:2 * H])
        g_g = jnp.tanh(gates[:, 2 * H:3 * H])
        o_g = jax.nn.sigmoid(gates[:, 3 * H:4 * H])
        c_new = f_g * c + i_g * g_g
        h_new = o_g * jnp.tanh(c_new)

        active = lens > (t0 + t)                      # (BC, 1) packed-sequence mask
        # padded positions of lang_out are exactly zero (pad_packed_sequence)
        hstage_ref[t] = jnp.where(active, h_new, 0.0)
        # freeze (h, c) once the sequence has ended -> carried h == h_{len-1}
        h = jnp.where(active, h_new, h)
        c = jnp.where(active, c_new, c)
        return h, c

    # Unroll capped at TC steps per grid iteration: cross-step overlap for the
    # scheduler without blowing the vreg budget at production T.
    h_fin, c_fin = jax.lax.fori_loop(0, TC, step, (h_ref[...], c_ref[...]),
                                     unroll=True)
    h_ref[...] = h_fin
    c_ref[...] = c_fin

    # One bulk, batch-first store for the whole chunk (vs TC masked per-step stores).
    out_ref[...] = jnp.transpose(hstage_ref[...], (1, 0, 2))

    # emb / scores blocks are revisited across the T axis; write once at the end.
    @pl.when(t_chunk == n_tchunks - 1)
    def _():
        emb_ref[...] = h_fin                          # lang_emb (h_n of last layer)
        scores_ref[...] = (jnp.dot(h_fin.astype(jnp.bfloat16), wcls_ref[...],
                                   preferred_element_type=jnp.float32)
                           + bcls_ref[...])           # lang_scores


@jax.jit
def lang_module_forward(lang_feat, lang_len, params):
    """lang_feat: [B, T, E] f32 (batch-first, like PyTorch); lang_len: [B] int.

    lang_out is padded to the full T (zeros + True mask beyond each length);
    PyTorch's pad_packed_sequence pads only to max(lang_len) -- slice on the
    consumer side if that exact width is needed (avoids a host sync here).
    """
    B, T, E = lang_feat.shape
    H = params["w_hh_t"].shape[0]
    C = params["w_cls_t"].shape[1]

    # Time-chunk size: multiple of 8 sublanes (or the full T).
    TC = 8 if T % 8 == 0 else T
    # Batch-chunk size: whole (tiny) batch here.  At production batch sizes use a
    # multiple of 8 (sublane-full) so the leading "parallel" grid axis has >1 chunk
    # and shards across both TensorCores on v7x.
    BC = B

    lens = lang_len.reshape(B, 1).astype(jnp.int32)

    out, emb, scores = pl.pallas_call(
        lstm_lang_kernel,
        grid_spec=pltpu.PrefetchScalarGridSpec(
            num_scalar_prefetch=0,
            grid=(B // BC, T // TC),
            in_specs=[
                pl.BlockSpec((BC, TC, E), lambda b, t: (b, t, 0)),
                pl.BlockSpec((BC, 1), lambda b, t: (b, 0)),
                pl.BlockSpec((E, 4 * H), lambda b, t: (0, 0)),
                pl.BlockSpec((H, 4 * H), lambda b, t: (0, 0)),
                pl.BlockSpec((1, 4 * H), lambda b, t: (0, 0)),
                pl.BlockSpec((H, C), lambda b, t: (0, 0)),
                pl.BlockSpec((1, C), lambda b, t: (0, 0)),
            ],
            out_specs=[
                pl.BlockSpec((BC, TC, H), lambda b, t: (b, t, 0)),
                pl.BlockSpec((BC, H), lambda b, t: (b, 0)),
                pl.BlockSpec((BC, C), lambda b, t: (b, 0)),
            ],
            scratch_shapes=[
                pltpu.VMEM((TC, BC, 4 * H), jnp.float32),   # gx (per-chunk x-proj)
                pltpu.VMEM((TC, BC, H), jnp.float32),       # staged per-step h
                pltpu.VMEM((BC, H), jnp.float32),           # h carry
                pltpu.VMEM((BC, H), jnp.float32),           # c carry
            ],
        ),
        out_shape=(
            jax.ShapeDtypeStruct((B, T, H), jnp.float32),
            jax.ShapeDtypeStruct((B, H), jnp.float32),
            jax.ShapeDtypeStruct((B, C), jnp.float32),
        ),
        compiler_params=pltpu.CompilerParams(
            dimension_semantics=("parallel", "arbitrary")),
    )(lang_feat.astype(jnp.float32), lens,
      params["w_ih_t"], params["w_hh_t"], params["b_gates"],
      params["w_cls_t"], params["b_cls"])

    # Exact padding mask from the lengths: tiny [B, T] op, no re-read of [B, T, H].
    t_ids = jnp.arange(T, dtype=jnp.int32)[None, :]
    lang_mask = t_ids >= lens

    return {
        "lang_out": out,            # [B, T, H]  (padded to full T, zeros past len)
        "lang_emb": emb,            # [B, H]
        "lang_mask": lang_mask,     # [B, T] bool (True on padded positions)
        "lang_scores": scores,      # [B, num_object_class]
    }


def init_params(key, emb_size, hidden_size, num_cls):
    """Deterministic init matching PyTorch LSTM/Linear shapes (U(-1/sqrt(H), 1/sqrt(H))).

    Matmul weights are stored bf16 (MXU operands); biases / state stay f32.
    """
    ks = jax.random.split(key, 6)
    s = 1.0 / jnp.sqrt(hidden_size)
    w_ih = jax.random.uniform(ks[0], (4 * hidden_size, emb_size), jnp.float32, -s, s)
    w_hh = jax.random.uniform(ks[1], (4 * hidden_size, hidden_size), jnp.float32, -s, s)
    b_ih = jax.random.uniform(ks[2], (4 * hidden_size,), jnp.float32, -s, s)
    b_hh = jax.random.uniform(ks[3], (4 * hidden_size,), jnp.float32, -s, s)
    w_cls = jax.random.uniform(ks[4], (num_cls, hidden_size), jnp.float32, -s, s)
    b_cls = jax.random.uniform(ks[5], (num_cls,), jnp.float32, -s, s)
    return {
        "w_ih_t": jnp.transpose(w_ih).astype(jnp.bfloat16),   # [E, 4H]
        "w_hh_t": jnp.transpose(w_hh).astype(jnp.bfloat16),   # [H, 4H]
        "b_gates": (b_ih + b_hh).reshape(1, -1),               # [1, 4H] f32
        "w_cls_t": jnp.transpose(w_cls).astype(jnp.bfloat16),  # [H, C]
        "b_cls": b_cls.reshape(1, -1),                          # [1, C] f32
    }


def ref_forward(lang_feat, lang_len, params):
    """Pure-JAX f32 reference of the packed-LSTM forward (self-check)."""
    B, T, E = lang_feat.shape
    H = params["w_hh_t"].shape[0]
    wih = params["w_ih_t"].astype(jnp.float32)
    whh = params["w_hh_t"].astype(jnp.float32)
    b = params["b_gates"]
    lens = lang_len.reshape(B, 1).astype(jnp.int32)

    def step(carry, xs):
        h, c = carry
        x_t, t = xs
        g = x_t @ wih + h @ whh + b
        i = jax.nn.sigmoid(g[:, :H])
        f = jax.nn.sigmoid(g[:, H:2 * H])
        gg = jnp.tanh(g[:, 2 * H:3 * H])
        o = jax.nn.sigmoid(g[:, 3 * H:])
        c_new = f * c + i * gg
        h_new = o * jnp.tanh(c_new)
        act = lens > t
        out_t = jnp.where(act, h_new, 0.0)
        return (jnp.where(act, h_new, h), jnp.where(act, c_new, c)), out_t

    xs = (jnp.transpose(lang_feat, (1, 0, 2)), jnp.arange(T, dtype=jnp.int32))
    (h_fin, _), outs = jax.lax.scan(
        step, (jnp.zeros((B, H), jnp.float32), jnp.zeros((B, H), jnp.float32)), xs)
    lang_out = jnp.transpose(outs, (1, 0, 2))
    scores = h_fin @ params["w_cls_t"].astype(jnp.float32) + params["b_cls"]
    return lang_out, h_fin, scores


if __name__ == "__main__":
    key = jax.random.PRNGKey(0)
    k_feat, k_params = jax.random.split(key)

    lang_feat = jax.random.normal(k_feat, (BATCH, SEQ, EMB), jnp.float32)
    lang_len = jnp.array([SEQ, 5], dtype=jnp.int32)    # per-sequence valid lengths
    # zero out padded positions of the input (as a real padded batch would be)
    t_idx = jnp.arange(SEQ)[None, :, None]
    lang_feat = jnp.where(t_idx < lang_len[:, None, None], lang_feat, 0.0)

    params = init_params(k_params, EMB, HIDDEN, NUM_CLS)

    out = lang_module_forward(lang_feat, lang_len, params)
    jax.block_until_ready(out)

    assert out["lang_out"].shape == (BATCH, SEQ, HIDDEN)
    assert out["lang_emb"].shape == (BATCH, HIDDEN)
    assert out["lang_mask"].shape == (BATCH, SEQ)
    assert out["lang_scores"].shape == (BATCH, NUM_CLS)

    # packed-sequence semantics: padded positions are exactly zero and masked
    assert bool(jnp.all(out["lang_out"][1, 5:, :] == 0.0))
    assert bool(jnp.all(out["lang_mask"][1, 5:]))
    assert bool(jnp.all(~out["lang_mask"][1, :5]))
    assert bool(jnp.all(~out["lang_mask"][0, :]))

    # numeric self-check vs pure-JAX f32 reference (loose tol: bf16 MXU operands)
    ref_out, ref_emb, ref_scores = ref_forward(lang_feat, lang_len, params)
    assert float(jnp.max(jnp.abs(out["lang_out"] - ref_out))) < 5e-2
    assert float(jnp.max(jnp.abs(out["lang_emb"] - ref_emb))) < 5e-2
    assert float(jnp.max(jnp.abs(out["lang_scores"] - ref_scores))) < 5e-2

    # TODO(synk): Dropout (word_drop / classifier dropout) is identity in eval mode;
    # the BERT branch (bert_model_name is not None) is not implemented.
    # TODO(synk): lang_len == 0 sequences return h0 (zeros) as lang_emb; PyTorch's
    # pack_padded_sequence rejects zero-length sequences, so that edge case diverges.
    # TODO(synk): W_hh MXU residency across unrolled steps (pltpu.matmul_push_rhs)
    # is left to the compiler; verify in the bundle dump before hand-driving the MXU.
    print("KERNEL_OK")
</pallas_src>

<mosaic_0001>
module attributes {stable_mosaic.version = 11 : i64} {
  func.func @lstm_lang_kernel(%arg0: i32, %arg1: i32, %arg2: memref<2x8x32xf32, #tpu.memory_space<vmem>>, %arg3: memref<2x1xi32, #tpu.memory_space<vmem>>, %arg4: memref<32x128xbf16, #tpu.memory_space<vmem>>, %arg5: memref<32x128xbf16, #tpu.memory_space<vmem>>, %arg6: memref<1x128xf32, #tpu.memory_space<vmem>>, %arg7: memref<32x10xbf16, #tpu.memory_space<vmem>>, %arg8: memref<1x10xf32, #tpu.memory_space<vmem>>, %arg9: memref<2x8x32xf32, #tpu.memory_space<vmem>>, %arg10: memref<2x32xf32, #tpu.memory_space<vmem>>, %arg11: memref<2x10xf32, #tpu.memory_space<vmem>>, %arg12: memref<8x2x128xf32, #tpu.memory_space<vmem>>, %arg13: memref<8x2x32xf32, #tpu.memory_space<vmem>>, %arg14: memref<2x32xf32, #tpu.memory_space<vmem>>, %arg15: memref<2x32xf32, #tpu.memory_space<vmem>>) attributes {dimension_semantics = [#tpu.dimension_semantics<parallel>, #tpu.dimension_semantics<arbitrary>], iteration_bounds = array<i64: 1, 2>, scalar_prefetch = 0 : i64, scratch_operands = 4 : i64, tpu.core_type = #tpu.core_type<tc>, window_params = [{transform_indices = @transform_0, window_bounds = array<i64: 2, 8, 32>}, {transform_indices = @transform_1, window_bounds = array<i64: 2, 1>}, {pipeline_mode = #tpu.pipeline_mode<synchronous>, transform_indices = @transform_2, window_bounds = array<i64: 32, 128>}, {pipeline_mode = #tpu.pipeline_mode<synchronous>, transform_indices = @transform_3, window_bounds = array<i64: 32, 128>}, {pipeline_mode = #tpu.pipeline_mode<synchronous>, transform_indices = @transform_4, window_bounds = array<i64: 1, 128>}, {pipeline_mode = #tpu.pipeline_mode<synchronous>, transform_indices = @transform_5, window_bounds = array<i64: 32, 10>}, {pipeline_mode = #tpu.pipeline_mode<synchronous>, transform_indices = @transform_6, window_bounds = array<i64: 1, 10>}, {transform_indices = @transform_7, window_bounds = array<i64: 2, 8, 32>}, {transform_indices = @transform_8, window_bounds = array<i64: 2, 32>}, {transform_indices = @transform_9, window_bounds = array<i64: 2, 10>}]} {
    %c0_i32 = arith.constant 0 : i32
    %0 = arith.cmpi eq, %arg1, %c0_i32 : i32
    %1 = arith.extui %0 : i1 to i32
    %c0_i32_0 = arith.constant 0 : i32
    %2 = arith.cmpi ne, %1, %c0_i32_0 : i32
    scf.if %2 {
      %cst_104 = arith.constant 0.000000e+00 : f32
      %410 = vector.broadcast %cst_104 : f32 to vector<2x32xf32>
      %c0_105 = arith.constant 0 : index
      %c0_106 = arith.constant 0 : index
      %411 = vector.load %arg14[%c0_105, %c0_106] : memref<2x32xf32, #tpu.memory_space<vmem>>, vector<2x32xf32>
      tpu.vector_store %arg14[%c0_105, %c0_106], %410 {strides = array<i32>} : memref<2x32xf32, #tpu.memory_space<vmem>>, vector<2x32xf32>,
      %cst_107 = arith.constant 0.000000e+00 : f32
      %412 = vector.broadcast %cst_107 : f32 to vector<2x32xf32>
      %c0_108 = arith.constant 0 : index
      %c0_109 = arith.constant 0 : index
      %413 = vector.load %arg15[%c0_108, %c0_109] : memref<2x32xf32, #tpu.memory_space<vmem>>, vector<2x32xf32>
      tpu.vector_store %arg15[%c0_108, %c0_109], %412 {strides = array<i32>} : memref<2x32xf32, #tpu.memory_space<vmem>>, vector<2x32xf32>,
    } else {
    }
    %c0 = arith.constant 0 : index
    %c0_1 = arith.constant 0 : index
    %3 = vector.load %arg3[%c0, %c0_1] : memref<2x1xi32, #tpu.memory_space<vmem>>, vector<2x1xi32>
    %c8_i32 = arith.constant 8 : i32
    %4 = arith.muli %arg1, %c8_i32 : i32
    %c0_2 = arith.constant 0 : index
    %c0_3 = arith.constant 0 : index
    %c0_4 = arith.constant 0 : index
    %5 = vector.load %arg2[%c0_2, %c0_3, %c0_4] : memref<2x8x32xf32, #tpu.memory_space<vmem>>, vector<2x8x32xf32>
    %6 = tpu.transpose %5, [1, 0, 2] : vector<2x8x32xf32> -> vector<8x2x32xf32>
    %7 = arith.truncf %6 : vector<8x2x32xf32> to vector<8x2x32xbf16>
    %c0_5 = arith.constant 0 : index
    %c0_6 = arith.constant 0 : index
    %8 = vector.load %arg4[%c0_5, %c0_6] : memref<32x128xbf16, #tpu.memory_space<vmem>>, vector<32x128xbf16>
    %cst = arith.constant dense<0.000000e+00> : vector<8x2x128xf32>
    %9 = tpu.matmul %7, %8, %cst {dimension_numbers = #tpu.dot_dimension_numbers<[2], [0], [0, 1], [1], [0, 0, 0, 1, 1, 1], [], []>} : vector<8x2x32xbf16>, vector<32x128xbf16>, vector<8x2x128xf32> -> vector<8x2x128xf32>
    %c0_7 = arith.constant 0 : index
    %c0_8 = arith.constant 0 : index
    %10 = vector.load %arg6[%c0_7, %c0_8] : memref<1x128xf32, #tpu.memory_space<vmem>>, vector<1x128xf32>
    %11 = vector.shape_cast %10 : vector<1x128xf32> to vector<1x1x128xf32>
    %12 = vector.broadcast %11 : vector<1x1x128xf32> to vector<8x2x128xf32>
    %13 = arith.addf %9, %12 : vector<8x2x128xf32>
    %c0_9 = arith.constant 0 : index
    %c0_10 = arith.constant 0 : index
    %c0_11 = arith.constant 0 : index
    %14 = vector.load %arg12[%c0_9, %c0_10, %c0_11] : memref<8x2x128xf32, #tpu.memory_space<vmem>>, vector<8x2x128xf32>
    tpu.vector_store %arg12[%c0_9, %c0_10, %c0_11], %13 {strides = array<i32>} : memref<8x2x128xf32, #tpu.memory_space<vmem>>, vector<8x2x128xf32>,
    %c0_12 = arith.constant 0 : index
    %c0_13 = arith.constant 0 : index
    %15 = vector.load %arg5[%c0_12, %c0_13] : memref<32x128xbf16, #tpu.memory_space<vmem>>, vector<32x128xbf16>
    %c0_14 = arith.constant 0 : index
    %c0_15 = arith.constant 0 : index
    %16 = vector.load %arg14[%c0_14, %c0_15] : memref<2x32xf32, #tpu.memory_space<vmem>>, vector<2x32xf32>
    %c0_16 = arith.constant 0 : index
    %c0_17 = arith.constant 0 : index
    %17 = vector.load %arg15[%c0_16, %c0_17] : memref<2x32xf32, #tpu.memory_space<vmem>>, vector<2x32xf32>
    %c0_i32_18 = arith.constant 0 : i32
    %18 = arith.index_cast %c0_i32_18 : i32 to index
    %c0_19 = arith.constant 0 : index
    %c0_20 = arith.constant 0 : index
    %19 = vector.load %arg12[%18, %c0_19, %c0_20] : memref<8x2x128xf32, #tpu.memory_space<vmem>>, vector<1x2x128xf32>
    %20 = vector.shape_cast %19 : vector<1x2x128xf32> to vector<2x128xf32>
    %21 = arith.truncf %16 : vector<2x32xf32> to vector<2x32xbf16>
    %cst_21 = arith.constant dense<0.000000e+00> : vector<2x128xf32>
    %22 = tpu.matmul %21, %15, %cst_21 {dimension_numbers = #tpu.dot_dimension_numbers<[1], [0], [0], [1], [0, 0, 1, 1], [], []>} : vector<2x32xbf16>, vector<32x128xbf16>, vector<2x128xf32> -> vector<2x128xf32>
    %23 = arith.addf %20, %22 : vector<2x128xf32>
    %24 = vector.extract_strided_slice %23 {offsets = [0, 0], sizes = [2, 32], strides = [1, 1]} : vector<2x128xf32> to vector<2x32xf32>
    %25 = arith.negf %24 : vector<2x32xf32>
    %26 = math.exp %25 : vector<2x32xf32>
    %cst_22 = arith.constant 1.000000e+00 : f32
    %27 = vector.broadcast %cst_22 : f32 to vector<2x32xf32>
    %28 = arith.addf %27, %26 : vector<2x32xf32>
    %29 = arith.divf %27, %28 : vector<2x32xf32>
    %30 = vector.extract_strided_slice %23 {offsets = [0, 32], sizes = [2, 32], strides = [1, 1]} : vector<2x128xf32> to vector<2x32xf32>
    %31 = arith.negf %30 : vector<2x32xf32>
    %32 = math.exp %31 : vector<2x32xf32>
    %cst_23 = arith.constant 1.000000e+00 : f32
    %33 = vector.broadcast %cst_23 : f32 to vector<2x32xf32>
    %34 = arith.addf %33, %32 : vector<2x32xf32>
    %35 = arith.divf %33, %34 : vector<2x32xf32>
    %36 = vector.extract_strided_slice %23 {offsets = [0, 64], sizes = [2, 32], strides = [1, 1]} : vector<2x128xf32> to vector<2x32xf32>
    %37 = math.tanh %36 : vector<2x32xf32>
    %38 = vector.extract_strided_slice %23 {offsets = [0, 96], sizes = [2, 32], strides = [1, 1]} : vector<2x128xf32> to vector<2x32xf32>
    %39 = arith.negf %38 : vector<2x32xf32>
    %40 = math.exp %39 : vector<2x32xf32>
    %cst_24 = arith.constant 1.000000e+00 : f32
    %41 = vector.broadcast %cst_24 : f32 to vector<2x32xf32>
    %42 = arith.addf %41, %40 : vector<2x32xf32>
    %43 = arith.divf %41, %42 : vector<2x32xf32>
    %44 = arith.mulf %35, %17 : vector<2x32xf32>
    %45 = arith.mulf %29, %37 : vector<2x32xf32>
    %46 = arith.addf %44, %45 : vector<2x32xf32>
    %47 = math.tanh %46 : vector<2x32xf32>
    %48 = arith.mulf %43, %47 : vector<2x32xf32>
    %49 = arith.addi %4, %c0_i32_18 : i32
    %50 = vector.broadcast %49 : i32 to vector<2x1xi32>
    %51 = arith.cmpi sgt, %3, %50 : vector<2x1xi32>
    %cst_25 = arith.constant 0.000000e+00 : f32
    %52 = vector.shape_cast %51 : vector<2x1xi1> to vector<2x1xi1>
    %53 = vector.broadcast %52 : vector<2x1xi1> to vector<2x32xi1>
    %54 = vector.broadcast %cst_25 : f32 to vector<2x32xf32>
    %55 = arith.select %53, %48, %54 : vector<2x32xi1>, vector<2x32xf32>
    %56 = arith.index_cast %c0_i32_18 : i32 to index
    %c0_26 = arith.constant 0 : index
    %c0_27 = arith.constant 0 : index
    %57 = vector.load %arg13[%56, %c0_26, %c0_27] : memref<8x2x32xf32, #tpu.memory_space<vmem>>, vector<1x2x32xf32>
    %58 = vector.shape_cast %57 : vector<1x2x32xf32> to vector<2x32xf32>
    %59 = vector.shape_cast %55 : vector<2x32xf32> to vector<1x2x32xf32>
    tpu.vector_store %arg13[%56, %c0_26, %c0_27], %59 {strides = array<i32>} : memref<8x2x32xf32, #tpu.memory_space<vmem>>, vector<1x2x32xf32>,
    %60 = vector.shape_cast %51 : vector<2x1xi1> to vector<2x1xi1>
    %61 = vector.broadcast %60 : vector<2x1xi1> to vector<2x32xi1>
    %62 = arith.select %61, %48, %16 : vector<2x32xi1>, vector<2x32xf32>
    %63 = vector.shape_cast %51 : vector<2x1xi1> to vector<2x1xi1>
    %64 = vector.broadcast %63 : vector<2x1xi1> to vector<2x32xi1>
    %65 = arith.select %64, %46, %17 : vector<2x32xi1>, vector<2x32xf32>
    %c1_i32 = arith.constant 1 : i32
    %66 = arith.index_cast %c1_i32 : i32 to index
    %c0_28 = arith.constant 0 : index
    %c0_29 = arith.constant 0 : index
    %67 = vector.load %arg12[%66, %c0_28, %c0_29] : memref<8x2x128xf32, #tpu.memory_space<vmem>>, vector<1x2x128xf32>
    %68 = vector.shape_cast %67 : vector<1x2x128xf32> to vector<2x128xf32>
    %69 = arith.truncf %62 : vector<2x32xf32> to vector<2x32xbf16>
    %cst_30 = arith.constant dense<0.000000e+00> : vector<2x128xf32>
    %70 = tpu.matmul %69, %15, %cst_30 {dimension_numbers = #tpu.dot_dimension_numbers<[1], [0], [0], [1], [0, 0, 1, 1], [], []>} : vector<2x32xbf16>, vector<32x128xbf16>, vector<2x128xf32> -> vector<2x128xf32>
    %71 = arith.addf %68, %70 : vector<2x128xf32>
    %72 = vector.extract_strided_slice %71 {offsets = [0, 0], sizes = [2, 32], strides = [1, 1]} : vector<2x128xf32> to vector<2x32xf32>
    %73 = arith.negf %72 : vector<2x32xf32>
    %74 = math.exp %73 : vector<2x32xf32>
    %cst_31 = arith.constant 1.000000e+00 : f32
    %75 = vector.broadcast %cst_31 : f32 to vector<2x32xf32>
    %76 = arith.addf %75, %74 : vector<2x32xf32>
    %77 = arith.divf %75, %76 : vector<2x32xf32>
    %78 = vector.extract_strided_slice %71 {offsets = [0, 32], sizes = [2, 32], strides = [1, 1]} : vector<2x128xf32> to vector<2x32xf32>
    %79 = arith.negf %78 : vector<2x32xf32>
    %80 = math.exp %79 : vector<2x32xf32>
    %cst_32 = arith.constant 1.000000e+00 : f32
    %81 = vector.broadcast %cst_32 : f32 to vector<2x32xf32>
    %82 = arith.addf %81, %80 : vector<2x32xf32>
    %83 = arith.divf %81, %82 : vector<2x32xf32>
    %84 = vector.extract_strided_slice %71 {offsets = [0, 64], sizes = [2, 32], strides = [1, 1]} : vector<2x128xf32> to vector<2x32xf32>
    %85 = math.tanh %84 : vector<2x32xf32>
    %86 = vector.extract_strided_slice %71 {offsets = [0, 96], sizes = [2, 32], strides = [1, 1]} : vector<2x128xf32> to vector<2x32xf32>
    %87 = arith.negf %86 : vector<2x32xf32>
    %88 = math.exp %87 : vector<2x32xf32>
    %cst_33 = arith.constant 1.000000e+00 : f32
    %89 = vector.broadcast %cst_33 : f32 to vector<2x32xf32>
    %90 = arith.addf %89, %88 : vector<2x32xf32>
    %91 = arith.divf %89, %90 : vector<2x32xf32>
    %92 = arith.mulf %83, %65 : vector<2x32xf32>
    %93 = arith.mulf %77, %85 : vector<2x32xf32>
    %94 = arith.addf %92, %93 : vector<2x32xf32>
    %95 = math.tanh %94 : vector<2x32xf32>
    %96 = arith.mulf %91, %95 : vector<2x32xf32>
    %97 = arith.addi %4, %c1_i32 : i32
    %98 = vector.broadcast %97 : i32 to vector<2x1xi32>
    %99 = arith.cmpi sgt, %3, %98 : vector<2x1xi32>
    %cst_34 = arith.constant 0.000000e+00 : f32
    %100 = vector.shape_cast %99 : vector<2x1xi1> to vector<2x1xi1>
    %101 = vector.broadcast %100 : vector<2x1xi1> to vector<2x32xi1>
    %102 = vector.broadcast %cst_34 : f32 to vector<2x32xf32>
    %103 = arith.select %101, %96, %102 : vector<2x32xi1>, vector<2x32xf32>
    %104 = arith.index_cast %c1_i32 : i32 to index
    %c0_35 = arith.constant 0 : index
    %c0_36 = arith.constant 0 : index
    %105 = vector.load %arg13[%104, %c0_35, %c0_36] : memref<8x2x32xf32, #tpu.memory_space<vmem>>, vector<1x2x32xf32>
    %106 = vector.shape_cast %105 : vector<1x2x32xf32> to vector<2x32xf32>
    %107 = vector.shape_cast %103 : vector<2x32xf32> to vector<1x2x32xf32>
    tpu.vector_store %arg13[%104, %c0_35, %c0_36], %107 {strides = array<i32>} : memref<8x2x32xf32, #tpu.memory_space<vmem>>, vector<1x2x32xf32>,
    %108 = vector.shape_cast %99 : vector<2x1xi1> to vector<2x1xi1>
    %109 = vector.broadcast %108 : vector<2x1xi1> to vector<2x32xi1>
    %110 = arith.select %109, %96, %62 : vector<2x32xi1>, vector<2x32xf32>
    %111 = vector.shape_cast %99 : vector<2x1xi1> to vector<2x1xi1>
    %112 = vector.broadcast %111 : vector<2x1xi1> to vector<2x32xi1>
    %113 = arith.select %112, %94, %65 : vector<2x32xi1>, vector<2x32xf32>
    %c2_i32 = arith.constant 2 : i32
    %114 = arith.index_cast %c2_i32 : i32 to index
    %c0_37 = arith.constant 0 : index
    %c0_38 = arith.constant 0 : index
    %115 = vector.load %arg12[%114, %c0_37, %c0_38] : memref<8x2x128xf32, #tpu.memory_space<vmem>>, vector<1x2x128xf32>
    %116 = vector.shape_cast %115 : vector<1x2x128xf32> to vector<2x128xf32>
    %117 = arith.truncf %110 : vector<2x32xf32> to vector<2x32xbf16>
    %cst_39 = arith.constant dense<0.000000e+00> : vector<2x128xf32>
    %118 = tpu.matmul %117, %15, %cst_39 {dimension_numbers = #tpu.dot_dimension_numbers<[1], [0], [0], [1], [0, 0, 1, 1], [], []>} : vector<2x32xbf16>, vector<32x128xbf16>, vector<2x128xf32> -> vector<2x128xf32>
    %119 = arith.addf %116, %118 : vector<2x128xf32>
    %120 = vector.extract_strided_slice %119 {offsets = [0, 0], sizes = [2, 32], strides = [1, 1]} : vector<2x128xf32> to vector<2x32xf32>
    %121 = arith.negf %120 : vector<2x32xf32>
    %122 = math.exp %121 : vector<2x32xf32>
    %cst_40 = arith.constant 1.000000e+00 : f32
    %123 = vector.broadcast %cst_40 : f32 to vector<2x32xf32>
    %124 = arith.addf %123, %122 : vector<2x32xf32>
    %125 = arith.divf %123, %124 : vector<2x32xf32>
    %126 = vector.extract_strided_slice %119 {offsets = [0, 32], sizes = [2, 32], strides = [1, 1]} : vector<2x128xf32> to vector<2x32xf32>
    %127 = arith.negf %126 : vector<2x32xf32>
    %128 = math.exp %127 : vector<2x32xf32>
    %cst_41 = arith.constant 1.000000e+00 : f32
    %129 = vector.broadcast %cst_41 : f32 to vector<2x32xf32>
    %130 = arith.addf %129, %128 : vector<2x32xf32>
    %131 = arith.divf %129, %130 : vector<2x32xf32>
    %132 = vector.extract_strided_slice %119 {offsets = [0, 64], sizes = [2, 32], strides = [1, 1]} : vector<2x128xf32> to vector<2x32xf32>
    %133 = math.tanh %132 : vector<2x32xf32>
    %134 = vector.extract_strided_slice %119 {offsets = [0, 96], sizes = [2, 32], strides = [1, 1]} : vector<2x128xf32> to vector<2x32xf32>
    %135 = arith.negf %134 : vector<2x32xf32>
    %136 = math.exp %135 : vector<2x32xf32>
    %cst_42 = arith.constant 1.000000e+00 : f32
    %137 = vector.broadcast %cst_42 : f32 to vector<2x32xf32>
    %138 = arith.addf %137, %136 : vector<2x32xf32>
    %139 = arith.divf %137, %138 : vector<2x32xf32>
    %140 = arith.mulf %131, %113 : vector<2x32xf32>
    %141 = arith.mulf %125, %133 : vector<2x32xf32>
    %142 = arith.addf %140, %141 : vector<2x32xf32>
    %143 = math.tanh %142 : vector<2x32xf32>
    %144 = arith.mulf %139, %143 : vector<2x32xf32>
    %145 = arith.addi %4, %c2_i32 : i32
    %146 = vector.broadcast %145 : i32 to vector<2x1xi32>
    %147 = arith.cmpi sgt, %3, %146 : vector<2x1xi32>
    %cst_43 = arith.constant 0.000000e+00 : f32
    %148 = vector.shape_cast %147 : vector<2x1xi1> to vector<2x1xi1>
    %149 = vector.broadcast %148 : vector<2x1xi1> to vector<2x32xi1>
    %150 = vector.broadcast %cst_43 : f32 to vector<2x32xf32>
    %151 = arith.select %149, %144, %150 : vector<2x32xi1>, vector<2x32xf32>
    %152 = arith.index_cast %c2_i32 : i32 to index
    %c0_44 = arith.constant 0 : index
    %c0_45 = arith.constant 0 : index
    %153 = vector.load %arg13[%152, %c0_44, %c0_45] : memref<8x2x32xf32, #tpu.memory_space<vmem>>, vector<1x2x32xf32>
    %154 = vector.shape_cast %153 : vector<1x2x32xf32> to vector<2x32xf32>
    %155 = vector.shape_cast %151 : vector<2x32xf32> to vector<1x2x32xf32>
    tpu.vector_store %arg13[%152, %c0_44, %c0_45], %155 {strides = array<i32>} : memref<8x2x32xf32, #tpu.memory_space<vmem>>, vector<1x2x32xf32>,
    %156 = vector.shape_cast %147 : vector<2x1xi1> to vector<2x1xi1>
    %157 = vector.broadcast %156 : vector<2x1xi1> to vector<2x32xi1>
    %158 = arith.select %157, %144, %110 : vector<2x32xi1>, vector<2x32xf32>
    %159 = vector.shape_cast %147 : vector<2x1xi1> to vector<2x1xi1>
    %160 = vector.broadcast %159 : vector<2x1xi1> to vector<2x32xi1>
    %161 = arith.select %160, %142, %113 : vector<2x32xi1>, vector<2x32xf32>
    %c3_i32 = arith.constant 3 : i32
    %162 = arith.index_cast %c3_i32 : i32 to index
    %c0_46 = arith.constant 0 : index
    %c0_47 = arith.constant 0 : index
    %163 = vector.load %arg12[%162, %c0_46, %c0_47] : memref<8x2x128xf32, #tpu.memory_space<vmem>>, vector<1x2x128xf32>
    %164 = vector.shape_cast %163 : vector<1x2x128xf32> to vector<2x128xf32>
    %165 = arith.truncf %158 : vector<2x32xf32> to vector<2x32xbf16>
    %cst_48 = arith.constant dense<0.000000e+00> : vector<2x128xf32>
    %166 = tpu.matmul %165, %15, %cst_48 {dimension_numbers = #tpu.dot_dimension_numbers<[1], [0], [0], [1], [0, 0, 1, 1], [], []>} : vector<2x32xbf16>, vector<32x128xbf16>, vector<2x128xf32> -> vector<2x128xf32>
    %167 = arith.addf %164, %166 : vector<2x128xf32>
    %168 = vector.extract_strided_slice %167 {offsets = [0, 0], sizes = [2, 32], strides = [1, 1]} : vector<2x128xf32> to vector<2x32xf32>
    %169 = arith.negf %168 : vector<2x32xf32>
    %170 = math.exp %169 : vector<2x32xf32>
    %cst_49 = arith.constant 1.000000e+00 : f32
    %171 = vector.broadcast %cst_49 : f32 to vector<2x32xf32>
    %172 = arith.addf %171, %170 : vector<2x32xf32>
    %173 = arith.divf %171, %172 : vector<2x32xf32>
    %174 = vector.extract_strided_slice %167 {offsets = [0, 32], sizes = [2, 32], strides = [1, 1]} : vector<2x128xf32> to vector<2x32xf32>
    %175 = arith.negf %174 : vector<2x32xf32>
    %176 = math.exp %175 : vector<2x32xf32>
    %cst_50 = arith.constant 1.000000e+00 : f32
    %177 = vector.broadcast %cst_50 : f32 to vector<2x32xf32>
    %178 = arith.addf %177, %176 : vector<2x32xf32>
    %179 = arith.divf %177, %178 : vector<2x32xf32>
    %180 = vector.extract_strided_slice %167 {offsets = [0, 64], sizes = [2, 32], strides = [1, 1]} : vector<2x128xf32> to vector<2x32xf32>
    %181 = math.tanh %180 : vector<2x32xf32>
    %182 = vector.extract_strided_slice %167 {offsets = [0, 96], sizes = [2, 32], strides = [1, 1]} : vector<2x128xf32> to vector<2x32xf32>
    %183 = arith.negf %182 : vector<2x32xf32>
    %184 = math.exp %183 : vector<2x32xf32>
    %cst_51 = arith.constant 1.000000e+00 : f32
    %185 = vector.broadcast %cst_51 : f32 to vector<2x32xf32>
    %186 = arith.addf %185, %184 : vector<2x32xf32>
    %187 = arith.divf %185, %186 : vector<2x32xf32>
    %188 = arith.mulf %179, %161 : vector<2x32xf32>
    %189 = arith.mulf %173, %181 : vector<2x32xf32>
    %190 = arith.addf %188, %189 : vector<2x32xf32>
    %191 = math.tanh %190 : vector<2x32xf32>
    %192 = arith.mulf %187, %191 : vector<2x32xf32>
    %193 = arith.addi %4, %c3_i32 : i32
    %194 = vector.broadcast %193 : i32 to vector<2x1xi32>
    %195 = arith.cmpi sgt, %3, %194 : vector<2x1xi32>
    %cst_52 = arith.constant 0.000000e+00 : f32
    %196 = vector.shape_cast %195 : vector<2x1xi1> to vector<2x1xi1>
    %197 = vector.broadcast %196 : vector<2x1xi1> to vector<2x32xi1>
    %198 = vector.broadcast %cst_52 : f32 to vector<2x32xf32>
    %199 = arith.select %197, %192, %198 : vector<2x32xi1>, vector<2x32xf32>
    %200 = arith.index_cast %c3_i32 : i32 to index
    %c0_53 = arith.constant 0 : index
    %c0_54 = arith.constant 0 : index
    %201 = vector.load %arg13[%200, %c0_53, %c0_54] : memref<8x2x32xf32, #tpu.memory_space<vmem>>, vector<1x2x32xf32>
    %202 = vector.shape_cast %201 : vector<1x2x32xf32> to vector<2x32xf32>
    %203 = vector.shape_cast %199 : vector<2x32xf32> to vector<1x2x32xf32>
    tpu.vector_store %arg13[%200, %c0_53, %c0_54], %203 {strides = array<i32>} : memref<8x2x32xf32, #tpu.memory_space<vmem>>, vector<1x2x32xf32>,
    %204 = vector.shape_cast %195 : vector<2x1xi1> to vector<2x1xi1>
    %205 = vector.broadcast %204 : vector<2x1xi1> to vector<2x32xi1>
    %206 = arith.select %205, %192, %158 : vector<2x32xi1>, vector<2x32xf32>
    %207 = vector.shape_cast %195 : vector<2x1xi1> to vector<2x1xi1>
    %208 = vector.broadcast %207 : vector<2x1xi1> to vector<2x32xi1>
    %209 = arith.select %208, %190, %161 : vector<2x32xi1>, vector<2x32xf32>
    %c4_i32 = arith.constant 4 : i32
    %210 = arith.index_cast %c4_i32 : i32 to index
    %c0_55 = arith.constant 0 : index
    %c0_56 = arith.constant 0 : index
    %211 = vector.load %arg12[%210, %c0_55, %c0_56] : memref<8x2x128xf32, #tpu.memory_space<vmem>>, vector<1x2x128xf32>
    %212 = vector.shape_cast %211 : vector<1x2x128xf32> to vector<2x128xf32>
    %213 = arith.truncf %206 : vector<2x32xf32> to vector<2x32xbf16>
    %cst_57 = arith.constant dense<0.000000e+00> : vector<2x128xf32>
    %214 = tpu.matmul %213, %15, %cst_57 {dimension_numbers = #tpu.dot_dimension_numbers<[1], [0], [0], [1], [0, 0, 1, 1], [], []>} : vector<2x32xbf16>, vector<32x128xbf16>, vector<2x128xf32> -> vector<2x128xf32>
    %215 = arith.addf %212, %214 : vector<2x128xf32>
    %216 = vector.extract_strided_slice %215 {offsets = [0, 0], sizes = [2, 32], strides = [1, 1]} : vector<2x128xf32> to vector<2x32xf32>
    %217 = arith.negf %216 : vector<2x32xf32>
    %218 = math.exp %217 : vector<2x32xf32>
    %cst_58 = arith.constant 1.000000e+00 : f32
    %219 = vector.broadcast %cst_58 : f32 to vector<2x32xf32>
    %220 = arith.addf %219, %218 : vector<2x32xf32>
    %221 = arith.divf %219, %220 : vector<2x32xf32>
    %222 = vector.extract_strided_slice %215 {offsets = [0, 32], sizes = [2, 32], strides = [1, 1]} : vector<2x128xf32> to vector<2x32xf32>
    %223 = arith.negf %222 : vector<2x32xf32>
    %224 = math.exp %223 : vector<2x32xf32>
    %cst_59 = arith.constant 1.000000e+00 : f32
    %225 = vector.broadcast %cst_59 : f32 to vector<2x32xf32>
    %226 = arith.addf %225, %224 : vector<2x32xf32>
    %227 = arith.divf %225, %226 : vector<2x32xf32>
    %228 = vector.extract_strided_slice %215 {offsets = [0, 64], sizes = [2, 32], strides = [1, 1]} : vector<2x128xf32> to vector<2x32xf32>
    %229 = math.tanh %228 : vector<2x32xf32>
    %230 = vector.extract_strided_slice %215 {offsets = [0, 96], sizes = [2, 32], strides = [1, 1]} : vector<2x128xf32> to vector<2x32xf32>
    %231 = arith.negf %230 : vector<2x32xf32>
    %232 = math.exp %231 : vector<2x32xf32>
    %cst_60 = arith.constant 1.000000e+00 : f32
    %233 = vector.broadcast %cst_60 : f32 to vector<2x32xf32>
    %234 = arith.addf %233, %232 : vector<2x32xf32>
    %235 = arith.divf %233, %234 : vector<2x32xf32>
    %236 = arith.mulf %227, %209 : vector<2x32xf32>
    %237 = arith.mulf %221, %229 : vector<2x32xf32>
    %238 = arith.addf %236, %237 : vector<2x32xf32>
    %239 = math.tanh %238 : vector<2x32xf32>
    %240 = arith.mulf %235, %239 : vector<2x32xf32>
    %241 = arith.addi %4, %c4_i32 : i32
    %242 = vector.broadcast %241 : i32 to vector<2x1xi32>
    %243 = arith.cmpi sgt, %3, %242 : vector<2x1xi32>
    %cst_61 = arith.constant 0.000000e+00 : f32
    %244 = vector.shape_cast %243 : vector<2x1xi1> to vector<2x1xi1>
    %245 = vector.broadcast %244 : vector<2x1xi1> to vector<2x32xi1>
    %246 = vector.broadcast %cst_61 : f32 to vector<2x32xf32>
    %247 = arith.select %245, %240, %246 : vector<2x32xi1>, vector<2x32xf32>
    %248 = arith.index_cast %c4_i32 : i32 to index
    %c0_62 = arith.constant 0 : index
    %c0_63 = arith.constant 0 : index
    %249 = vector.load %arg13[%248, %c0_62, %c0_63] : memref<8x2x32xf32, #tpu.memory_space<vmem>>, vector<1x2x32xf32>
    %250 = vector.shape_cast %249 : vector<1x2x32xf32> to vector<2x32xf32>
    %251 = vector.shape_cast %247 : vector<2x32xf32> to vector<1x2x32xf32>
    tpu.vector_store %arg13[%248, %c0_62, %c0_63], %251 {strides = array<i32>} : memref<8x2x32xf32, #tpu.memory_space<vmem>>, vector<1x2x32xf32>,
    %252 = vector.shape_cast %243 : vector<2x1xi1> to vector<2x1xi1>
    %253 = vector.broadcast %252 : vector<2x1xi1> to vector<2x32xi1>
    %254 = arith.select %253, %240, %206 : vector<2x32xi1>, vector<2x32xf32>
    %255 = vector.shape_cast %243 : vector<2x1xi1> to vector<2x1xi1>
    %256 = vector.broadcast %255 : vector<2x1xi1> to vector<2x32xi1>
    %257 = arith.select %256, %238, %209 : vector<2x32xi1>, vector<2x32xf32>
    %c5_i32 = arith.constant 5 : i32
    %258 = arith.index_cast %c5_i32 : i32 to index
    %c0_64 = arith.constant 0 : index
    %c0_65 = arith.constant 0 : index
    %259 = vector.load %arg12[%258, %c0_64, %c0_65] : memref<8x2x128xf32, #tpu.memory_space<vmem>>, vector<1x2x128xf32>
    %260 = vector.shape_cast %259 : vector<1x2x128xf32> to vector<2x128xf32>
    %261 = arith.truncf %254 : vector<2x32xf32> to vector<2x32xbf16>
    %cst_66 = arith.constant dense<0.000000e+00> : vector<2x128xf32>
    %262 = tpu.matmul %261, %15, %cst_66 {dimension_numbers = #tpu.dot_dimension_numbers<[1], [0], [0], [1], [0, 0, 1, 1], [], []>} : vector<2x32xbf16>, vector<32x128xbf16>, vector<2x128xf32> -> vector<2x128xf32>
    %263 = arith.addf %260, %262 : vector<2x128xf32>
    %264 = vector.extract_strided_slice %263 {offsets = [0, 0], sizes = [2, 32], strides = [1, 1]} : vector<2x128xf32> to vector<2x32xf32>
    %265 = arith.negf %264 : vector<2x32xf32>
    %266 = math.exp %265 : vector<2x32xf32>
    %cst_67 = arith.constant 1.000000e+00 : f32
    %267 = vector.broadcast %cst_67 : f32 to vector<2x32xf32>
    %268 = arith.addf %267, %266 : vector<2x32xf32>
    %269 = arith.divf %267, %268 : vector<2x32xf32>
    %270 = vector.extract_strided_slice %263 {offsets = [0, 32], sizes = [2, 32], strides = [1, 1]} : vector<2x128xf32> to vector<2x32xf32>
    %271 = arith.negf %270 : vector<2x32xf32>
    %272 = math.exp %271 : vector<2x32xf32>
    %cst_68 = arith.constant 1.000000e+00 : f32
    %273 = vector.broadcast %cst_68 : f32 to vector<2x32xf32>
    %274 = arith.addf %273, %272 : vector<2x32xf32>
    %275 = arith.divf %273, %274 : vector<2x32xf32>
    %276 = vector.extract_strided_slice %263 {offsets = [0, 64], sizes = [2, 32], strides = [1, 1]} : vector<2x128xf32> to vector<2x32xf32>
    %277 = math.tanh %276 : vector<2x32xf32>
    %278 = vector.extract_strided_slice %263 {offsets = [0, 96], sizes = [2, 32], strides = [1, 1]} : vector<2x128xf32> to vector<2x32xf32>
    %279 = arith.negf %278 : vector<2x32xf32>
    %280 = math.exp %279 : vector<2x32xf32>
    %cst_69 = arith.constant 1.000000e+00 : f32
    %281 = vector.broadcast %cst_69 : f32 to vector<2x32xf32>
    %282 = arith.addf %281, %280 : vector<2x32xf32>
    %283 = arith.divf %281, %282 : vector<2x32xf32>
    %284 = arith.mulf %275, %257 : vector<2x32xf32>
    %285 = arith.mulf %269, %277 : vector<2x32xf32>
    %286 = arith.addf %284, %285 : vector<2x32xf32>
    %287 = math.tanh %286 : vector<2x32xf32>
    %288 = arith.mulf %283, %287 : vector<2x32xf32>
    %289 = arith.addi %4, %c5_i32 : i32
    %290 = vector.broadcast %289 : i32 to vector<2x1xi32>
    %291 = arith.cmpi sgt, %3, %290 : vector<2x1xi32>
    %cst_70 = arith.constant 0.000000e+00 : f32
    %292 = vector.shape_cast %291 : vector<2x1xi1> to vector<2x1xi1>
    %293 = vector.broadcast %292 : vector<2x1xi1> to vector<2x32xi1>
    %294 = vector.broadcast %cst_70 : f32 to vector<2x32xf32>
    %295 = arith.select %293, %288, %294 : vector<2x32xi1>, vector<2x32xf32>
    %296 = arith.index_cast %c5_i32 : i32 to index
    %c0_71 = arith.constant 0 : index
    %c0_72 = arith.constant 0 : index
    %297 = vector.load %arg13[%296, %c0_71, %c0_72] : memref<8x2x32xf32, #tpu.memory_space<vmem>>, vector<1x2x32xf32>
    %298 = vector.shape_cast %297 : vector<1x2x32xf32> to vector<2x32xf32>
    %299 = vector.shape_cast %295 : vector<2x32xf32> to vector<1x2x32xf32>
    tpu.vector_store %arg13[%296, %c0_71, %c0_72], %299 {strides = array<i32>} : memref<8x2x32xf32, #tpu.memory_space<vmem>>, vector<1x2x32xf32>,
    %300 = vector.shape_cast %291 : vector<2x1xi1> to vector<2x1xi1>
    %301 = vector.broadcast %300 : vector<2x1xi1> to vector<2x32xi1>
    %302 = arith.select %301, %288, %254 : vector<2x32xi1>, vector<2x32xf32>
    %303 = vector.shape_cast %291 : vector<2x1xi1> to vector<2x1xi1>
    %304 = vector.broadcast %303 : vector<2x1xi1> to vector<2x32xi1>
    %305 = arith.select %304, %286, %257 : vector<2x32xi1>, vector<2x32xf32>
    %c6_i32 = arith.constant 6 : i32
    %306 = arith.index_cast %c6_i32 : i32 to index
    %c0_73 = arith.constant 0 : index
    %c0_74 = arith.constant 0 : index
    %307 = vector.load %arg12[%306, %c0_73, %c0_74] : memref<8x2x128xf32, #tpu.memory_space<vmem>>, vector<1x2x128xf32>
    %308 = vector.shape_cast %307 : vector<1x2x128xf32> to vector<2x128xf32>
    %309 = arith.truncf %302 : vector<2x32xf32> to vector<2x32xbf16>
    %cst_75 = arith.constant dense<0.000000e+00> : vector<2x128xf32>
    %310 = tpu.matmul %309, %15, %cst_75 {dimension_numbers = #tpu.dot_dimension_numbers<[1], [0], [0], [1], [0, 0, 1, 1], [], []>} : vector<2x32xbf16>, vector<32x128xbf16>, vector<2x128xf32> -> vector<2x128xf32>
    %311 = arith.addf %308, %310 : vector<2x128xf32>
    %312 = vector.extract_strided_slice %311 {offsets = [0, 0], sizes = [2, 32], strides = [1, 1]} : vector<2x128xf32> to vector<2x32xf32>
    %313 = arith.negf %312 : vector<2x32xf32>
    %314 = math.exp %313 : vector<2x32xf32>
    %cst_76 = arith.constant 1.000000e+00 : f32
    %315 = vector.broadcast %cst_76 : f32 to vector<2x32xf32>
    %316 = arith.addf %315, %314 : vector<2x32xf32>
    %317 = arith.divf %315, %316 : vector<2x32xf32>
    %318 = vector.extract_strided_slice %311 {offsets = [0, 32], sizes = [2, 32], strides = [1, 1]} : vector<2x128xf32> to vector<2x32xf32>
    %319 = arith.negf %318 : vector<2x32xf32>
    %320 = math.exp %319 : vector<2x32xf32>
    %cst_77 = arith.constant 1.000000e+00 : f32
    %321 = vector.broadcast %cst_77 : f32 to vector<2x32xf32>
    %322 = arith.addf %321, %320 : vector<2x32xf32>
    %323 = arith.divf %321, %322 : vector<2x32xf32>
    %324 = vector.extract_strided_slice %311 {offsets = [0, 64], sizes = [2, 32], strides = [1, 1]} : vector<2x128xf32> to vector<2x32xf32>
    %325 = math.tanh %324 : vector<2x32xf32>
    %326 = vector.extract_strided_slice %311 {offsets = [0, 96], sizes = [2, 32], strides = [1, 1]} : vector<2x128xf32> to vector<2x32xf32>
    %327 = arith.negf %326 : vector<2x32xf32>
    %328 = math.exp %327 : vector<2x32xf32>
    %cst_78 = arith.constant 1.000000e+00 : f32
    %329 = vector.broadcast %cst_78 : f32 to vector<2x32xf32>
    %330 = arith.addf %329, %328 : vector<2x32xf32>
    %331 = arith.divf %329, %330 : vector<2x32xf32>
    %332 = arith.mulf %323, %305 : vector<2x32xf32>
    %333 = arith.mulf %317, %325 : vector<2x32xf32>
    %334 = arith.addf %332, %333 : vector<2x32xf32>
    %335 = math.tanh %334 : vector<2x32xf32>
    %336 = arith.mulf %331, %335 : vector<2x32xf32>
    %337 = arith.addi %4, %c6_i32 : i32
    %338 = vector.broadcast %337 : i32 to vector<2x1xi32>
    %339 = arith.cmpi sgt, %3, %338 : vector<2x1xi32>
    %cst_79 = arith.constant 0.000000e+00 : f32
    %340 = vector.shape_cast %339 : vector<2x1xi1> to vector<2x1xi1>
    %341 = vector.broadcast %340 : vector<2x1xi1> to vector<2x32xi1>
    %342 = vector.broadcast %cst_79 : f32 to vector<2x32xf32>
    %343 = arith.select %341, %336, %342 : vector<2x32xi1>, vector<2x32xf32>
    %344 = arith.index_cast %c6_i32 : i32 to index
    %c0_80 = arith.constant 0 : index
    %c0_81 = arith.constant 0 : index
    %345 = vector.load %arg13[%344, %c0_80, %c0_81] : memref<8x2x32xf32, #tpu.memory_space<vmem>>, vector<1x2x32xf32>
    %346 = vector.shape_cast %345 : vector<1x2x32xf32> to vector<2x32xf32>
    %347 = vector.shape_cast %343 : vector<2x32xf32> to vector<1x2x32xf32>
    tpu.vector_store %arg13[%344, %c0_80, %c0_81], %347 {strides = array<i32>} : memref<8x2x32xf32, #tpu.memory_space<vmem>>, vector<1x2x32xf32>,
    %348 = vector.shape_cast %339 : vector<2x1xi1> to vector<2x1xi1>
    %349 = vector.broadcast %348 : vector<2x1xi1> to vector<2x32xi1>
    %350 = arith.select %349, %336, %302 : vector<2x32xi1>, vector<2x32xf32>
    %351 = vector.shape_cast %339 : vector<2x1xi1> to vector<2x1xi1>
    %352 = vector.broadcast %351 : vector<2x1xi1> to vector<2x32xi1>
    %353 = arith.select %352, %334, %305 : vector<2x32xi1>, vector<2x32xf32>
    %c7_i32 = arith.constant 7 : i32
    %354 = arith.index_cast %c7_i32 : i32 to index
    %c0_82 = arith.constant 0 : index
    %c0_83 = arith.constant 0 : index
    %355 = vector.load %arg12[%354, %c0_82, %c0_83] : memref<8x2x128xf32, #tpu.memory_space<vmem>>, vector<1x2x128xf32>
    %356 = vector.shape_cast %355 : vector<1x2x128xf32> to vector<2x128xf32>
    %357 = arith.truncf %350 : vector<2x32xf32> to vector<2x32xbf16>
    %cst_84 = arith.constant dense<0.000000e+00> : vector<2x128xf32>
    %358 = tpu.matmul %357, %15, %cst_84 {dimension_numbers = #tpu.dot_dimension_numbers<[1], [0], [0], [1], [0, 0, 1, 1], [], []>} : vector<2x32xbf16>, vector<32x128xbf16>, vector<2x128xf32> -> vector<2x128xf32>
    %359 = arith.addf %356, %358 : vector<2x128xf32>
    %360 = vector.extract_strided_slice %359 {offsets = [0, 0], sizes = [2, 32], strides = [1, 1]} : vector<2x128xf32> to vector<2x32xf32>
    %361 = arith.negf %360 : vector<2x32xf32>
    %362 = math.exp %361 : vector<2x32xf32>
    %cst_85 = arith.constant 1.000000e+00 : f32
    %363 = vector.broadcast %cst_85 : f32 to vector<2x32xf32>
    %364 = arith.addf %363, %362 : vector<2x32xf32>
    %365 = arith.divf %363, %364 : vector<2x32xf32>
    %366 = vector.extract_strided_slice %359 {offsets = [0, 32], sizes = [2, 32], strides = [1, 1]} : vector<2x128xf32> to vector<2x32xf32>
    %367 = arith.negf %366 : vector<2x32xf32>
    %368 = math.exp %367 : vector<2x32xf32>
    %cst_86 = arith.constant 1.000000e+00 : f32
    %369 = vector.broadcast %cst_86 : f32 to vector<2x32xf32>
    %370 = arith.addf %369, %368 : vector<2x32xf32>
    %371 = arith.divf %369, %370 : vector<2x32xf32>
    %372 = vector.extract_strided_slice %359 {offsets = [0, 64], sizes = [2, 32], strides = [1, 1]} : vector<2x128xf32> to vector<2x32xf32>
    %373 = math.tanh %372 : vector<2x32xf32>
    %374 = vector.extract_strided_slice %359 {offsets = [0, 96], sizes = [2, 32], strides = [1, 1]} : vector<2x128xf32> to vector<2x32xf32>
    %375 = arith.negf %374 : vector<2x32xf32>
    %376 = math.exp %375 : vector<2x32xf32>
    %cst_87 = arith.constant 1.000000e+00 : f32
    %377 = vector.broadcast %cst_87 : f32 to vector<2x32xf32>
    %378 = arith.addf %377, %376 : vector<2x32xf32>
    %379 = arith.divf %377, %378 : vector<2x32xf32>
    %380 = arith.mulf %371, %353 : vector<2x32xf32>
    %381 = arith.mulf %365, %373 : vector<2x32xf32>
    %382 = arith.addf %380, %381 : vector<2x32xf32>
    %383 = math.tanh %382 : vector<2x32xf32>
    %384 = arith.mulf %379, %383 : vector<2x32xf32>
    %385 = arith.addi %4, %c7_i32 : i32
    %386 = vector.broadcast %385 : i32 to vector<2x1xi32>
    %387 = arith.cmpi sgt, %3, %386 : vector<2x1xi32>
    %cst_88 = arith.constant 0.000000e+00 : f32
    %388 = vector.shape_cast %387 : vector<2x1xi1> to vector<2x1xi1>
    %389 = vector.broadcast %388 : vector<2x1xi1> to vector<2x32xi1>
    %390 = vector.broadcast %cst_88 : f32 to vector<2x32xf32>
    %391 = arith.select %389, %384, %390 : vector<2x32xi1>, vector<2x32xf32>
    %392 = arith.index_cast %c7_i32 : i32 to index
    %c0_89 = arith.constant 0 : index
    %c0_90 = arith.constant 0 : index
    %393 = vector.load %arg13[%392, %c0_89, %c0_90] : memref<8x2x32xf32, #tpu.memory_space<vmem>>, vector<1x2x32xf32>
    %394 = vector.shape_cast %393 : vector<1x2x32xf32> to vector<2x32xf32>
    %395 = vector.shape_cast %391 : vector<2x32xf32> to vector<1x2x32xf32>
    tpu.vector_store %arg13[%392, %c0_89, %c0_90], %395 {strides = array<i32>} : memref<8x2x32xf32, #tpu.memory_space<vmem>>, vector<1x2x32xf32>,
    %396 = vector.shape_cast %387 : vector<2x1xi1> to vector<2x1xi1>
    %397 = vector.broadcast %396 : vector<2x1xi1> to vector<2x32xi1>
    %398 = arith.select %397, %384, %350 : vector<2x32xi1>, vector<2x32xf32>
    %399 = vector.shape_cast %387 : vector<2x1xi1> to vector<2x1xi1>
    %400 = vector.broadcast %399 : vector<2x1xi1> to vector<2x32xi1>
    %401 = arith.select %400, %382, %353 : vector<2x32xi1>, vector<2x32xf32>
    %c8_i32_91 = arith.constant 8 : i32
    %c0_92 = arith.constant 0 : index
    %c0_93 = arith.constant 0 : index
    %402 = vector.load %arg14[%c0_92, %c0_93] : memref<2x32xf32, #tpu.memory_space<vmem>>, vector<2x32xf32>
    tpu.vector_store %arg14[%c0_92, %c0_93], %398 {strides = array<i32>} : memref<2x32xf32, #tpu.memory_space<vmem>>, vector<2x32xf32>,
    %c0_94 = arith.constant 0 : index
    %c0_95 = arith.constant 0 : index
    %403 = vector.load %arg15[%c0_94, %c0_95] : memref<2x32xf32, #tpu.memory_space<vmem>>, vector<2x32xf32>
    tpu.vector_store %arg15[%c0_94, %c0_95], %401 {strides = array<i32>} : memref<2x32xf32, #tpu.memory_space<vmem>>, vector<2x32xf32>,
    %c0_96 = arith.constant 0 : index
    %c0_97 = arith.constant 0 : index
    %c0_98 = arith.constant 0 : index
    %404 = vector.load %arg13[%c0_96, %c0_97, %c0_98] : memref<8x2x32xf32, #tpu.memory_space<vmem>>, vector<8x2x32xf32>
    %405 = tpu.transpose %404, [1, 0, 2] : vector<8x2x32xf32> -> vector<2x8x32xf32>
    %c0_99 = arith.constant 0 : index
    %c0_100 = arith.constant 0 : index
    %c0_101 = arith.constant 0 : index
    %406 = vector.load %arg9[%c0_99, %c0_100, %c0_101] : memref<2x8x32xf32, #tpu.memory_space<vmem>>, vector<2x8x32xf32>
    tpu.vector_store %arg9[%c0_99, %c0_100, %c0_101], %405 {strides = array<i32>} : memref<2x8x32xf32, #tpu.memory_space<vmem>>, vector<2x8x32xf32>,
    %c1_i32_102 = arith.constant 1 : i32
    %407 = arith.cmpi eq, %arg1, %c1_i32_102 : i32
    %408 = arith.extui %407 : i1 to i32
    %c0_i32_103 = arith.constant 0 : i32
    %409 = arith.cmpi ne, %408, %c0_i32_103 : i32
    scf.if %409 {
      %c0_104 = arith.constant 0 : index
      %c0_105 = arith.constant 0 : index
      %410 = vector.load %arg10[%c0_104, %c0_105] : memref<2x32xf32, #tpu.memory_space<vmem>>, vector<2x32xf32>
      tpu.vector_store %arg10[%c0_104, %c0_105], %398 {strides = array<i32>} : memref<2x32xf32, #tpu.memory_space<vmem>>, vector<2x32xf32>,
      %411 = arith.truncf %398 : vector<2x32xf32> to vector<2x32xbf16>
      %c0_106 = arith.constant 0 : index
      %c0_107 = arith.constant 0 : index
      %412 = vector.load %arg7[%c0_106, %c0_107] : memref<32x10xbf16, #tpu.memory_space<vmem>>, vector<32x10xbf16>
      %cst_108 = arith.constant dense<0.000000e+00> : vector<2x10xf32>
      %413 = tpu.matmul %411, %412, %cst_108 {dimension_numbers = #tpu.dot_dimension_numbers<[1], [0], [0], [1], [0, 0, 1, 1], [], []>} : vector<2x32xbf16>, vector<32x10xbf16>, vector<2x10xf32> -> vector<2x10xf32>
      %c0_109 = arith.constant 0 : index
      %c0_110 = arith.constant 0 : index
      %414 = vector.load %arg8[%c0_109, %c0_110] : memref<1x10xf32, #tpu.memory_space<vmem>>, vector<1x10xf32>
      %415 = vector.broadcast %414 : vector<1x10xf32> to vector<2x10xf32>
      %416 = arith.addf %413, %415 : vector<2x10xf32>
      %c0_111 = arith.constant 0 : index
      %c0_112 = arith.constant 0 : index
      %417 = vector.load %arg11[%c0_111, %c0_112] : memref<2x10xf32, #tpu.memory_space<vmem>>, vector<2x10xf32>
      tpu.vector_store %arg11[%c0_111, %c0_112], %416 {strides = array<i32>} : memref<2x10xf32, #tpu.memory_space<vmem>>, vector<2x10xf32>,
    } else {
    }
    return
  }
  func.func @transform_0(%arg0: i32, %arg1: i32) -> (i32, i32, i32) {
    %c0_i32 = arith.constant 0 : i32
    %c0_i32_0 = arith.constant 0 : i32
    return %arg0, %arg1, %c0_i32 : i32, i32, i32
  }
  func.func @transform_1(%arg0: i32, %arg1: i32) -> (i32, i32) {
    %c0_i32 = arith.constant 0 : i32
    %c0_i32_0 = arith.constant 0 : i32
    return %arg0, %c0_i32 : i32, i32
  }
  func.func @transform_2(%arg0: i32, %arg1: i32) -> (i32, i32) {
    %c0_i32 = arith.constant 0 : i32
    %c0_i32_0 = arith.constant 0 : i32
    %c0_i32_1 = arith.constant 0 : i32
    return %c0_i32, %c0_i32_0 : i32, i32
  }
  func.func @transform_3(%arg0: i32, %arg1: i32) -> (i32, i32) {
    %c0_i32 = arith.constant 0 : i32
    %c0_i32_0 = arith.constant 0 : i32
    %c0_i32_1 = arith.constant 0 : i32
    return %c0_i32, %c0_i32_0 : i32, i32
  }
  func.func @transform_4(%arg0: i32, %arg1: i32) -> (i32, i32) {
    %c0_i32 = arith.constant 0 : i32
    %c0_i32_0 = arith.constant 0 : i32
    %c0_i32_1 = arith.constant 0 : i32
    return %c0_i32, %c0_i32_0 : i32, i32
  }
  func.func @transform_5(%arg0: i32, %arg1: i32) -> (i32, i32) {
    %c0_i32 = arith.constant 0 : i32
    %c0_i32_0 = arith.constant 0 : i32
    %c0_i32_1 = arith.constant 0 : i32
    return %c0_i32, %c0_i32_0 : i32, i32
  }
  func.func @transform_6(%arg0: i32, %arg1: i32) -> (i32, i32) {
    %c0_i32 = arith.constant 0 : i32
    %c0_i32_0 = arith.constant 0 : i32
    %c0_i32_1 = arith.constant 0 : i32
    return %c0_i32, %c0_i32_0 : i32, i32
  }
  func.func @transform_7(%arg0: i32, %arg1: i32) -> (i32, i32, i32) {
    %c0_i32 = arith.constant 0 : i32
    %c0_i32_0 = arith.constant 0 : i32
    return %arg0, %arg1, %c0_i32 : i32, i32, i32
  }
  func.func @transform_8(%arg0: i32, %arg1: i32) -> (i32, i32) {
    %c0_i32 = arith.constant 0 : i32
    %c0_i32_0 = arith.constant 0 : i32
    return %arg0, %c0_i32 : i32, i32
  }
  func.func @transform_9(%arg0: i32, %arg1: i32) -> (i32, i32) {
    %c0_i32 = arith.constant 0 : i32
    %c0_i32_0 = arith.constant 0 : i32
    return %arg0, %c0_i32 : i32, i32
  }
}

</mosaic_0001>

<bundles_post_ra>
// kernel: lang_module_forward.1
= control target key start
LH: loop header
LB: loop body
LE: loop exit
PB: predicated region body
PF: predicated region fallthrough
CT: control target
= control target key end

     0   :  { %s2481_s0 = inlined_call_operand.hbm [shape: f32[2,16,32], index: 0, kind: input, shape index: {}]   ;;  %s2482_s1 = inlined_call_operand.vmem [shape: s32[2,1], index: 1, kind: input, shape index: {}]   ;;  %s2483_s2 = inlined_call_operand.vmem [shape: bf16[32,128], index: 2, kind: input, shape index: {}]   ;;  %s2484_s3 = inlined_call_operand.hbm [shape: bf16[32,128], index: 3, kind: input, shape index: {}]   ;;  %s2485_s4 = inlined_call_operand.vmem [shape: f32[1,128], index: 4, kind: input, shape index: {}]   ;;  %s2486_s5 = inlined_call_operand.vmem [shape: bf16[32,10], index: 5, kind: input, shape index: {}]   ;;  %s2487_s6 = inlined_call_operand.vmem [shape: f32[1,10], index: 6, kind: input, shape index: {}]   ;;  %s2488_s7 = inlined_call_operand.hbm [shape: f32[2,16,32], index: 7, kind: output, shape index: {0}]   ;;  %s2489_s8 = inlined_call_operand.hbm [shape: f32[2,32], index: 8, kind: output, shape index: {1}]   ;;  %s2490_s9 = inlined_call_operand.hbm [shape: f32[2,10], index: 9, kind: output, shape index: {2}]  }
   0x1   :  { %2497 = sst [smem:[#allocation23_spill]] %s2484_s3 }
   0x2   :  { %2498 = sst [smem:[#allocation24_spill]] %s2488_s7 }
   0x3   :  { %2499 = sst [smem:[#allocation25_spill]] %s2489_s8 }
   0x4   :  { %2500 = sst [smem:[#allocation26_spill]] %s2490_s9 }
   0x5   :  { %15 = vsyncpa [#allocation7], 0 }
   0x6   :  { %17 = vsyncpa [#allocation7 + $0x1], 0 }
   0x7   :  { %18 = vsyncpa [#allocation10], 0 }
   0x8   :  { %19 = vsyncpa [#allocation8], 0 }
   0x9   :  { %21 = vsyncpa [#allocation8 + $0x1], 0 }
   0xa   :  { %22 = vsyncpa [#allocation13], 0  ;;  %s2034_s30 = smov 0   ;;  %s2036_s10 = smov 0  }
   0xb   :  { %s2038_s11 = smov 0   ;;  %s2040_s12 = smov 0  }
   0xc   :  { %s2042_s13 = smov 0   ;;  %s2044_s14 = smov 0  }
   0xd LB: > { %2501 = sst [smem:[#allocation19_spill]] %s1943_s30  ;;  %s1514_s15 = sadd.s32 4294967295, %s1963_s14   ;;  %s1963_s14 = sphi %s2044_s14, %s28_s14   ;;  %s1959_s13 = sphi %s2042_s13, %s2525_s13   ;;  %s1955_s12 = sphi %s2040_s12, %s2524_s12   ;;  %s1951_s11 = sphi %s2038_s11, %s2523_s11   ;;  %s1947_s10 = sphi %s2036_s10, %s2522_s10   ;;  %s1943_s30 = sphi %s2034_s30, %s2521_s30  }
   0xe   : > { %2502 = sst [smem:[#allocation20_spill]] %s1963_s14  ;;  %s1515_s16 = sadd.s32 4294967294, %s1963_s14  }
   0xf   : > { %p62_p0 = scmp.ne.s32.totalorder %s1947_s10, %s1943_s30  ;;  %p2068_p1 = scmp.eq.s32.totalorder %s1514_s15, 0 }
  0x10   : > { %p2072_p2 = scmp.eq.s32.totalorder %s1514_s15, 1  ;;  %p225_p3 = scmp.eq.s32.totalorder %s1515_s16, 1 }
  0x11   : > { %p2078_p4 = por %p2068_p1, %p62_p0  ;;  %p1516_p5 = scmp.ge.s32.totalorder %s1963_s14, 1 }
  0x12   : > { %p2083_p6 = por %p225_p3, %p62_p0  ;;  %p284_p7 = scmp.lt.s32.totalorder %s1963_s14, 3 }
  0x13   : > { %s2508_s3 = sld [smem:[#allocation23_spill]]  ;;  %s1965_s25 = smov [#allocation9]  }
  0x14   : > { %s2506_s20 = scalar_select %p2083_p6, 1, 0 }
  0x15   : > { %p2091_p8 = pnand %p1516_p5, %p284_p7  ;;  %s307_s26 = sshll.u32 %s1965_s25, 4  ;;  %s308_s26 = int_to_ptr.vmem [resolvable:$true] %s307_s26 }
  0x16   : > { %2507 = sst [smem:[#allocation21_spill]] %s2506_s20  ;;  %p1519_p11 = scmp.ge.s32.totalorder %s1963_s14, 2 }
  0x17   : > { %p1601_p9 = pneg %p2091_p8  ;;  %s1966_s27 = smov 64  }
  0x18   : > { %s1967_s28 = smov 4   ;;  %s37_s29 = sadd.s32 1, %s1959_s13 }
  0x19   : > { %s305_s23 = sshll.u32 %s2508_s3, 4  ;;  %p1602_p10 = pnand %p1601_p9, %p2068_p1  ;;  %s306_s23 = int_to_ptr.hbm [resolvable:$true] %s305_s23 }
  0x1a   : > { %p38_p12 = scmp.ge.s32.totalorder %s37_s29, 2  ;;  %s49_s15 = sadd.s32 1, %s1951_s11 }
  0x1b   : > { %1604 = dma.hbm_to_vmem [thread:$0]  (!%p1602_p10), %s306_s23, 256, %s308_s26, [#allocation10], %s1966_s27, %s1966_s27, %s1967_s28  }
  0x1c   : > { %p56_p13 = scmp.ne.s32.totalorder %s1951_s11, %s1947_s10  ;;  %p57_p0 = scmp.eq.s32.totalorder %s1963_s14, 0 }
  0x1d   : > { %s2527_s29 = smov (%p38_p12, %s37_s29), 0  ;;  %p1614_p7 = scmp.lt.s32.totalorder %s1963_s14, 2 }
  0x1e   : > { %2510 = sst [smem:[#allocation22_spill]] %s2527_s29  ;;  %p2107_p3 = por %p57_p0, %p56_p13 }
  0x1f   : > { %p2113_p5 = por %p2072_p2, %p56_p13  ;;  %s45_s22 = ssub.s32 %s1959_s13, %s2527_s29 }
  0x20   : > { %p47_p9 = scmp.eq.s32.totalorder %s45_s22, 0  ;;  %s330_s23 = sand.u32 1, %s1951_s11  }
  0x21   : > { %s1520_s25 = sshll.u32 %s330_s23, 4  ;;  %s1521_s27 = sshll.u32 %s1959_s13, 3 }
  0x22   : > { %s2122_s26 = scalar_select %p47_p9, %s1951_s11, %s49_s15  }
  0x23   : > { %s341_s20 = scalar_lea.hbm %s2481_s0, %s1521_s27  ;;  %s334_s30 = scalar_lea.vmem [#allocation6], %s1520_s25 }
  0x24   : > { %s344_s9 = sshll.u32 %s334_s30, 4  ;;  %s342_s7 = sshll.u32 %s341_s20, 4  ;;  %s345_s9 = int_to_ptr.vmem [resolvable:$true] %s344_s9  ;;  %s343_s7 = int_to_ptr.hbm [resolvable:$true] %s342_s7 }
  0x25   : > { %p1606_p10 = pnand %p1614_p7, %p2107_p3  ;;  %s331_s8 = scalar_lea.sflag [#allocation7], %s330_s23 }
  0x26   : > { %s1968_s29 = smov 256   ;;  %s1969_s14 = smov 128  }
  0x27   : > { %s1970_s22 = smov 8   ;;  %356 = sbr.rel (%p2091_p8) target bundleno = 5078 (0x13d6), region = 48 }
  0x28   : > { %1608 = dma.hbm_to_vmem [thread:$0]  (!%p1606_p10), %s343_s7, 256, %s345_s9, %s331_s8, %s1968_s29, %s1969_s14, %s1970_s22  }
  0x29   : > { %s2133_s15 = sand.u32 (!%p2091_p8), 1, %s1947_s10  }
  0x2a   : > { %s1523_s3 = sshll.u32 (!%p2091_p8), %s2133_s15, 4  ;;  %s359_s30 = scalar_lea.sflag (!%p2091_p8), [#allocation7], %s2133_s15 }
  0x2b   : > { %s362_s20 = scalar_lea.vmem (!%p2091_p8), [#allocation6], %s1523_s3 }
  0x2c   : > { %1926 = dma.done.wait (%p2078_p4), %s359_s30, 256  }
  0x2d   : > { %1928 = vsyncadd (%p2078_p4), %s359_s30, 4294967040 }
  0x2e   : > { %1930 = dma.done.wait (%p2068_p1), [#allocation10], 256  }
  0x2f   : > { %1932 = vsyncadd (%p2068_p1), [#allocation10], 4294967040  ;;  %s2145_s7 = scalar_lea.vmem [#allocation11], %s1523_s3  ;;  %p1526_p8 = scmp.ne.s32.totalorder %s1955_s12, 0 }
  0x31   : > { %417 = sbr.rel (%p1526_p8) target bundleno = 57 (0x39), region = 60 }
  0x36   : > { %vm418_vm0 = vcmask 254976   ;;  %v1971_v0 = vmov 0.0  }
  0x37   : > { %419 = vst.msk [vmem:[#allocation4] sm:$0x3] %vm418_vm0, %v1971_v0 }
  0x38   : > { %420 = vst.msk [vmem:[#allocation5] sm:$0x3] %vm418_vm0, %v1971_v0 }
  0x39 PF: > { %v1580_v1 = vld [vmem:[%s2483_s2 + $0x8] sm:$0xff]  ;;  %v2151_v2 = vld [vmem:[#allocation9 + $0x8] sm:$0xff]  ;;  %vm426_vm1 = vcmask 1047556   ;;  %v1972_v5 = vmov 1983009808   ;;  %v1579_v7 = vld [vmem:[%s2483_s2] sm:$0xff] }
  0x3a   : > { %v423_v3 = vld [vmem:[%s362_s20] sm:$0xff]  ;;  %v424_v4 = vld [vmem:[%s362_s20 + $0x8] sm:$0xff]  ;;  %v429_v6 = vunpack.c.l.s4 %v1972_v5  ;;  %557 = vmatpush.bf16.msra.mxu0 %v1580_v1  ;;  %616 = vmatpush.bf16.msra.mxu1 %v2151_v2  ;;  %v1973_v11 = vmov 1934713408   ;;  %vm548_vm2 = vcmask 261120   ;;  %s1974_s29 = smov 64  }
  0x3b   : > { %v2157_v8 = vld [vmem:[#allocation9] sm:$0xff]  ;;  %v425_v9 = vrot.slane %v423_v3, 4  ;;  %v436_v10 = vrot.slane %v424_v4, 4  ;;  %v451_v12 = vunpack.c.l.s4 %v1973_v11  ;;  %700 = vmatpush.bf16.msra.mxu2 %v2151_v2  ;;  %777 = vmatpush.bf16.msra.mxu3 %v2151_v2  ;;  %v1691_v51 = vld [vmem:[%s2485_s4] ss:$0 sm:$0xff]  ;;  %s1975_s16 = smov 32  }
  0x3c   : > { %v2159_v13 = vunpack.c.0.s8 %v429_v6  ;;  %s2208_s23 = sshll.u32 %s1955_s12, 3  ;;  %s1977_s28 = smov 96  }
  0x3d   : > { %v427_v15 = vsel %vm426_vm1, 0.0, %v425_v9  ;;  %v437_v16 = vsel %vm426_vm1, 0.0, %v436_v10  ;;  %v2174_v22 = vunpack.c.0.s8 %v451_v12  ;;  %v2213_v10 = vld [vmem:[%s2482_s1] sm:$0x3]  ;;  %v665_v11 = vstv %s2208_s23  ;;  %s745_s22 = sadd.s32 1, %s2208_s23  ;;  %s822_s3 = sadd.s32 2, %s2208_s23 }
  0x3e   : > { %v2161_v14 = vld [vmem:[#allocation4] sm:$0x3]  ;;  %v431_v18 = vperm.slane %v423_v3, %v2159_v13  ;;  %v435_v19 = vperm.slane %v427_v15, %v2159_v13  ;;  %v441_v20 = vperm.slane %v424_v4, %v2159_v13  ;;  %v445_v21 = vperm.slane %v437_v16, %v2159_v13  ;;  %558 = vmatpush.bf16.msra.mxu0 %v1579_v7  ;;  %s899_s30 = sadd.s32 3, %s2208_s23  ;;  %s976_s20 = sadd.s32 4, %s2208_s23 }
  0x3f   : > { %v594_v17 = vpack.c.bf16 %v2161_v14, %v2161_v14  ;;  %617 = vmatpush.bf16.msra.mxu1 %v2157_v8  ;;  %701 = vmatpush.bf16.msra.mxu2 %v2157_v8  ;;  %v592_v6 = vld [vmem:[#allocation5] sm:$0x3]  ;;  %v1976_v15 = vmov 0   ;;  %vm666_vm3 = vcmp.gt.s32.totalorder %v2213_v10, %v665_v11  ;;  %s1053_s8 = sadd.s32 5, %s2208_s23  ;;  %s1130_s9 = sadd.s32 6, %s2208_s23 }
  0x40   : > { %v446_v23 = vrot.slane %v441_v20, 4  ;;  %v448_v24 = vrot.slane %v431_v18, 4  ;;  %v458_v25 = vrot.slane %v445_v21, 4  ;;  %v460_v26 = vrot.slane %v435_v19, 4  ;;  %778 = vmatpush.bf16.msra.mxu3 %v2157_v8  ;;  %1688 = vset.pattern.permute.xlu2 %v1976_v15  ;;  %s1207_s14 = sadd.s32 7, %s2208_s23  ;;  %p1561_p1 = scmp.ne.s32.totalorder %s1955_s12, 1 }
  0x41   : > { %1689 = vset.pattern.permute.xlu1 %v1976_v15  ;;  %v667_v16 = vsel %vm666_vm3, 1, %v1976_v15  ;;  %1690 = vset.pattern.permute.xlu0 %v1976_v15  ;;  %s1978_s24 = smov (!%p1561_p1), 32  }
  0x42   : > { %854 = vmatpush.bf16.msrb.mxu0 %v2151_v2  ;;  %v447_v27 = vsel %vm426_vm1, %v446_v23, %v431_v18  ;;  %v449_v28 = vsel %vm426_vm1, %v441_v20, %v448_v24  ;;  %v459_v29 = vsel %vm426_vm1, %v458_v25, %v435_v19  ;;  %v461_v30 = vsel %vm426_vm1, %v445_v21, %v460_v26 }
  0x43   : > { %931 = vmatpush.bf16.msrb.mxu1 %v2151_v2  ;;  %v453_v31 = vperm.slane %v447_v27, %v2174_v22  ;;  %v457_v32 = vperm.slane %v449_v28, %v2174_v22  ;;  %v465_v33 = vperm.slane %v459_v29, %v2174_v22  ;;  %v469_v34 = vperm.slane %v461_v30, %v2174_v22 }
  0x44   : > { %1545 = vmatmul.msk.bf16.vlgmr.msra.gmra.mxu1 %vm548_vm2, %v594_v17  ;;  %1008 = vmatpush.bf16.msrb.mxu2 %v2151_v2 }
  0x45   : > { %1085 = vmatpush.bf16.msrb.mxu3 %v2151_v2  ;;  %v470_v35 = vrot.slane %v453_v31, 4  ;;  %v472_v36 = vrot.slane %v457_v32, 4  ;;  %v474_v37 = vrot.slane %v465_v33, 4  ;;  %v476_v38 = vrot.slane %v469_v34, 4  ;;  %669 = vperm.xlu2 %1688, %v667_v16  }
  0x46   : > { %855 = vmatpush.bf16.msrb.mxu0 %v2157_v8  ;;  %v478_v39 = vpack.c.bf16 %v453_v31, %v453_v31  ;;  %v480_v40 = vpack.c.bf16 %v457_v32, %v457_v32  ;;  %v482_v47 = vpack.c.bf16 %v465_v33, %v465_v33  ;;  %v484_v49 = vpack.c.bf16 %v469_v34, %v469_v34 }
  0x47   : > { %932 = vmatpush.bf16.msrb.mxu1 %v2157_v8  ;;  %v471_v41 = vsel %vm426_vm1, 0.0, %v470_v35  ;;  %v473_v42 = vsel %vm426_vm1, 0.0, %v472_v36  ;;  %v475_v43 = vsel %vm426_vm1, 0.0, %v474_v37  ;;  %v477_v44 = vsel %vm426_vm1, 0.0, %v476_v38 }
  0x48   : > { %1009 = vmatpush.bf16.msrb.mxu2 %v2157_v8  ;;  %v479_v45 = vpack.c.bf16 %v471_v41, %v471_v41  ;;  %v481_v46 = vpack.c.bf16 %v473_v42, %v473_v42  ;;  %494 = vst [vmem:[#allocation1] ss:$9 sm:$0xff] %v478_v39  ;;  %v483_v48 = vpack.c.bf16 %v475_v43, %v475_v43 }
  0x49   : > { %500 = vst [vmem:[#allocation1 + $0x2] ss:$9 sm:$0xff] %v480_v40  ;;  %1086 = vmatpush.bf16.msrb.mxu3 %v2157_v8  ;;  %v485_v50 = vpack.c.bf16 %v477_v44, %v477_v44 }
  0x4a   : > { %497 = vst [vmem:[#allocation1 + $0x1] ss:$9 sm:$0xff] %v479_v45  ;;  %v746_v45 = vstv %s745_s22 }
  0x4b   : > { %503 = vst [vmem:[#allocation1 + $0x3] ss:$9 sm:$0xff] %v481_v46  ;;  %vm747_vm9 = vcmp.gt.s32.totalorder %v2213_v10, %v746_v45 }
  0x4c   : > { %506 = vst [vmem:[#allocation1 + $0x4] ss:$9 sm:$0xff] %v482_v47  ;;  %v748_v46 = vsel %vm747_vm9, 1, %v1976_v15 }
  0x4d   : > { %509 = vst [vmem:[#allocation1 + $0x5] ss:$9 sm:$0xff] %v483_v48  ;;  %680 = vrot.lane.b32.xlu2 %v2161_v14, %s1977_s28 }
  0x4e   : > { %512 = vst [vmem:[#allocation1 + $0x6] ss:$9 sm:$0xff] %v484_v49 }
  0x4f   : > { %515 = vst [vmem:[#allocation1 + $0x7] ss:$9 sm:$0xff] %v485_v50 }
  0x50   : > { %537 = vst [vmem:[#allocation1 + $0x20] ss:$4 sm:$0xff] %v1691_v51 }
  0x51   : > { %539 = vst [vmem:[#allocation1 + $0x21] ss:$4 sm:$0xff] %v1691_v51 }
  0x52   : > { %541 = vst [vmem:[#allocation1 + $0x22] ss:$4 sm:$0xff] %v1691_v51 }
  0x53   : > { %543 = vst [vmem:[#allocation1 + $0x23] ss:$4 sm:$0xff] %v1691_v51 }
  0x56   : > { %v516_v52 = vld [vmem:[#allocation1] sm:$0xff] }
  0x57   : > { %529 = vst [vmem:[#allocation1] ss:$4 sm:$0xff] %v1691_v51  ;;  %1536 = vmatmul.msk.bf16.vlgmr.msra.gmra.mxu0 %vm548_vm2, %v516_v52 }
  0x58   : > { %531 = vst [vmem:[#allocation1 + $0x1] ss:$4 sm:$0xff] %v1691_v51  ;;  %1162 = vmatpush.bf16.msra.mxu0 %v2151_v2 }
  0x59   : > { %533 = vst [vmem:[#allocation1 + $0x2] ss:$4 sm:$0xff] %v1691_v51 }
  0x5a   : > { %535 = vst [vmem:[#allocation1 + $0x3] ss:$4 sm:$0xff] %v1691_v51  ;;  %v545_v61 = vld.sshfl [vmem:[#allocation1 + $0x20] sm:$0xff pattern:$0x73625140] }
  0x5c   : > { %1163 = vmatpush.bf16.msra.mxu0 %v2157_v8 }
  0x61   : > { %v544_v55 = vld.sshfl [vmem:[#allocation1] sm:$0xff pattern:$0x73625140] }
  0x9f   : > { %v2225_v34 = vpop.permute.xlu2 %669 }
  0xa0   : > { %vm671_vm8 = vcmp.eq.s32.totalorder %v2225_v34, 1 }
  0xa7   : > { %v681_v36 = vpop.permute.xlu2 %680 }
  0xc1   : > { %v619_v53 = vpop.f32.mrf.mxu1 }
  0xc9   : > { %v621_v54 = vpop.f32.mrf.mxu1 }
  0xd4   : > { %v560_v56 = vpop.f32.mrf.mxu0 }
  0xd5   : > { %v561_v57 = vadd.f32 %v560_v56, %v544_v55 }
  0xd7   : > { %v567_v58 = vrot.slane %v561_v57, 2  ;;  %v568_v59 = vrot.slane %v561_v57, 4  ;;  %v569_v60 = vrot.slane %v561_v57, 6  ;;  %579 = vst [vmem:[#allocation2] sm:$0x3] %v561_v57 }
  0xd9   : > { %580 = vst [vmem:[#allocation2 + $0x2] sm:$0x3] %v567_v58 }
  0xda   : > { %581 = vst [vmem:[#allocation2 + $0x4] sm:$0x3] %v568_v59 }
  0xdb   : > { %582 = vst [vmem:[#allocation2 + $0x6] sm:$0x3] %v569_v60 }
  0xdc   : > { %v562_v62 = vpop.f32.mrf.mxu0 }
  0xdd   : > { %v563_v63 = vadd.f32 %v562_v62, %v545_v61 }
  0xde   : > { %v593_v0 = vld [vmem:[#allocation2] sm:$0x3] }
  0xdf   : > { %v623_v1 = vadd.f32 %v619_v53, %v593_v0  ;;  %v570_v2 = vrot.slane %v563_v63, 2  ;;  %v571_v3 = vrot.slane %v563_v63, 4  ;;  %v572_v4 = vrot.slane %v563_v63, 6  ;;  %583 = vst [vmem:[#allocation2 + $0x8] sm:$0x3] %v563_v63 }
  0xe0   : > { %v686_v40 = vld [vmem:[#allocation2 + $0x2] sm:$0x3] }
  0xe1   : > { %1692 = vtanh.f32 %v623_v1  ;;  %584 = vst [vmem:[#allocation2 + $0xa] sm:$0x3] %v570_v2  ;;  %v1546_v7 = vmul.f32 -1.442695, %v623_v1 }
  0xe2   : > { %585 = vst [vmem:[#allocation2 + $0xc] sm:$0x3] %v571_v3 }
  0xe3   : > { %586 = vst [vmem:[#allocation2 + $0xe] sm:$0x3] %v572_v4  ;;  %1694 = vpow2.f32 %v1546_v7 }
  0xe7   : > { %v1693_v5 = vpop.eup %1692 }
  0xe8   : > { %650 = vrot.lane.b32.xlu0 %v1693_v5, %s1974_s29 }
  0xe9   : > { %v1695_v8 = vpop.eup %1694 }
  0xea   : > { %v627_v9 = vadd.f32 1.0, %v1695_v8 }
  0xec   : > { %1696 = vrcp.f32 %v627_v9  ;;  %v639_v21 = vand.u32 2147483648, %v627_v9  ;;  %vm633_vm5 = vweird.f32 %v627_v9  ;;  %v637_v23 = vand.u32 2147483647, %v627_v9 }
  0xee   : > { %v640_v25 = vor.u32 1.1754944e-38, %v639_v21  ;;  %vm638_vm7 = vcmp.eq.f32.partialorder %v637_v23, 8.507059e+37  ;;  %v823_v21 = vstv %s822_s3 }
  0xef   : > { %vm824_vm15 = vcmp.gt.s32.totalorder %v2213_v10, %v823_v21 }
  0xf0   : > { %645 = vrot.lane.b32.xlu0 %v592_v6, %s1975_s16  ;;  %v825_v23 = vsel %vm824_vm15, 1, %v1976_v15 }
  0xf2   : > { %v1697_v12 = vpop.eup %1696 }
  0xf3   : > { %v629_v17 = vmul.f32 %v1697_v12, %v627_v9  ;;  %vm634_vm4 = vweird.f32 %v1697_v12  ;;  %v763_v9 = vld [vmem:[#allocation2 + $0x4] sm:$0x3] }
  0xf4   : > { %vm635_vm6 = vmor %vm633_vm5, %vm634_vm4 }
  0xf5   : > { %v630_v18 = vsub.f32 1.0, %v629_v17 }
  0xf7   : > { %v631_v19 = vmul.f32 %v1697_v12, %v630_v18 }
  0xf9   : > { %v632_v20 = vadd.f32 %v1697_v12, %v631_v19 }
  0xfb   : > { %v636_v24 = vsel %vm635_vm6, %v1697_v12, %v632_v20 }
  0xfc   : > { %v641_v27 = vsel %vm638_vm7, %v640_v25, %v636_v24  ;;  %v900_v24 = vstv %s899_s30 }
  0xfd   : > { %vm901_vm0 = vcmp.gt.s32.totalorder %v2213_v10, %v900_v24  ;;  %v917_v24 = vld [vmem:[#allocation2 + $0x8] sm:$0x3] }
 0x15a   : > { %v651_v26 = vpop.permute.xlu0 %650 }
 0x15b   : > { %v653_v28 = vmul.f32 %v651_v26, %v641_v27  ;;  %v902_v26 = vsel %vm901_vm0, 1, %v1976_v15 }
 0x15d   : > { %655 = vrot.lane.b32.xlu1 %v653_v28, %s1975_s16 }
 0x162   : > { %v646_v29 = vpop.permute.xlu0 %645 }
 0x163   : > { %v648_v30 = vmul.f32 %v646_v29, %v641_v27 }
 0x1cf   : > { %v656_v31 = vpop.permute.xlu1 %655 }
 0x1d0   : > { %v658_v32 = vadd.f32 %v656_v31, %v648_v30 }
 0x1d2   : > { %1698 = vtanh.f32 %v658_v32  ;;  %v684_v62 = vsel %vm671_vm8, %v658_v32, %v646_v29 }
 0x1d8   : > { %v1699_v33 = vpop.eup %1698 }
 0x1d9   : > { %661 = vrot.lane.b32.xlu1 %v1699_v33, %s1974_s29 }
 0x24b   : > { %v662_v35 = vpop.permute.xlu1 %661 }
 0x24c   : > { %v2227_v37 = vmul.f32 %v662_v35, %v641_v27 }
 0x24e   : > { %v683_v14 = vsel %vm671_vm8, %v2227_v37, %v681_v36 }
 0x24f   : > { %v687_v38 = vpack.c.bf16 %v683_v14, %v683_v14 }
 0x251   : > { %689 = vrot.lane.b32.xlu0 %v687_v38, %s1975_s16 }
 0x2c3   : > { %v690_v39 = vpop.permute.xlu0 %689 }
 0x2c4   : > { %1547 = vmatmul.msk.bf16.vlgmr.msra.gmra.mxu2 %vm548_vm2, %v690_v39 }
 0x347   : > { %v703_v41 = vpop.f32.mrf.mxu2 }
 0x348   : > { %v707_v42 = vadd.f32 %v703_v41, %v686_v40 }
 0x34a   : > { %1700 = vtanh.f32 %v707_v42  ;;  %v1548_v47 = vmul.f32 -1.442695, %v707_v42 }
 0x34c   : > { %1702 = vpow2.f32 %v1548_v47 }
 0x34f   : > { %v705_v43 = vpop.f32.mrf.mxu2 }
 0x350   : > { %v1701_v44 = vpop.eup %1700 }
 0x351   : > { %730 = vrot.lane.b32.xlu1 %v1701_v44, %s1974_s29 }
 0x352   : > { %v1703_v48 = vpop.eup %1702 }
 0x353   : > { %v711_v49 = vadd.f32 1.0, %v1703_v48 }
 0x355   : > { %1704 = vrcp.f32 %v711_v49  ;;  %v723_v55 = vand.u32 2147483648, %v711_v49  ;;  %vm717_vm11 = vweird.f32 %v711_v49  ;;  %v721_v56 = vand.u32 2147483647, %v711_v49 }
 0x357   : > { %v724_v58 = vor.u32 1.1754944e-38, %v723_v55  ;;  %vm722_vm13 = vcmp.eq.f32.partialorder %v721_v56, 8.507059e+37 }
 0x359   : > { %750 = vperm.xlu1 %1689, %v748_v46  }
 0x35b   : > { %v1705_v50 = vpop.eup %1704 }
 0x35c   : > { %v713_v51 = vmul.f32 %v1705_v50, %v711_v49  ;;  %vm718_vm10 = vweird.f32 %v1705_v50 }
 0x35d   : > { %vm719_vm12 = vmor %vm717_vm11, %vm718_vm10 }
 0x35e   : > { %v714_v52 = vsub.f32 1.0, %v713_v51 }
 0x360   : > { %v715_v53 = vmul.f32 %v1705_v50, %v714_v52 }
 0x362   : > { %v716_v54 = vadd.f32 %v1705_v50, %v715_v53 }
 0x364   : > { %v720_v57 = vsel %vm719_vm12, %v1705_v50, %v716_v54  ;;  %v840_v50 = vld [vmem:[#allocation2 + $0x6] sm:$0x3] }
 0x365   : > { %v725_v60 = vsel %vm722_vm13, %v724_v58, %v720_v57 }
 0x366   : > { %v728_v63 = vmul.f32 %v725_v60, %v684_v62 }
 0x3c3   : > { %v731_v59 = vpop.permute.xlu1 %730 }
 0x3c4   : > { %v733_v61 = vmul.f32 %v731_v59, %v725_v60 }
 0x3c6   : > { %735 = vrot.lane.b32.xlu2 %v733_v61, %s1975_s16 }
 0x3cb   : > { %v2243_v3 = vpop.permute.xlu1 %750 }
 0x3cc   : > { %vm752_vm14 = vcmp.eq.s32.totalorder %v2243_v3, 1 }
 0x420   : > { %v736_v0 = vpop.permute.xlu2 %735 }
 0x421   : > { %v738_v1 = vadd.f32 %v736_v0, %v728_v63 }
 0x423   : > { %1706 = vtanh.f32 %v738_v1  ;;  %v761_v39 = vsel %vm752_vm14, %v738_v1, %v684_v62 }
 0x429   : > { %v1707_v2 = vpop.eup %1706 }
 0x42a   : > { %741 = vrot.lane.b32.xlu0 %v1707_v2, %s1974_s29 }
 0x49c   : > { %v742_v4 = vpop.permute.xlu0 %741 }
 0x49d   : > { %v2245_v5 = vmul.f32 %v742_v4, %v725_v60 }
 0x49f   : > { %v760_v6 = vsel %vm752_vm14, %v2245_v5, %v683_v14 }
 0x4a0   : > { %v764_v7 = vpack.c.bf16 %v760_v6, %v760_v6 }
 0x4a2   : > { %766 = vrot.lane.b32.xlu2 %v764_v7, %s1975_s16 }
 0x4fc   : > { %v767_v8 = vpop.permute.xlu2 %766 }
 0x4fd   : > { %1549 = vmatmul.msk.bf16.vlgmr.msra.gmra.mxu3 %vm548_vm2, %v767_v8 }
 0x580   : > { %v780_v11 = vpop.f32.mrf.mxu3 }
 0x581   : > { %v784_v12 = vadd.f32 %v780_v11, %v763_v9 }
 0x583   : > { %1708 = vtanh.f32 %v784_v12  ;;  %v1550_v18 = vmul.f32 -1.442695, %v784_v12 }
 0x585   : > { %1710 = vpow2.f32 %v1550_v18 }
 0x588   : > { %v782_v16 = vpop.f32.mrf.mxu3 }
 0x589   : > { %v1709_v17 = vpop.eup %1708 }
 0x58a   : > { %807 = vrot.lane.b32.xlu0 %v1709_v17, %s1974_s29 }
 0x58b   : > { %v1711_v19 = vpop.eup %1710 }
 0x58c   : > { %v788_v20 = vadd.f32 1.0, %v1711_v19 }
 0x58e   : > { %1712 = vrcp.f32 %v788_v20  ;;  %v800_v31 = vand.u32 2147483648, %v788_v20  ;;  %vm794_vm4 = vweird.f32 %v788_v20  ;;  %v798_v32 = vand.u32 2147483647, %v788_v20 }
 0x590   : > { %v801_v35 = vor.u32 1.1754944e-38, %v800_v31  ;;  %vm799_vm6 = vcmp.eq.f32.partialorder %v798_v32, 8.507059e+37 }
 0x592   : > { %827 = vperm.xlu0 %1690, %v825_v23  }
 0x594   : > { %v1713_v25 = vpop.eup %1712 }
 0x595   : > { %v790_v27 = vmul.f32 %v1713_v25, %v788_v20  ;;  %vm795_vm3 = vweird.f32 %v1713_v25 }
 0x596   : > { %vm796_vm5 = vmor %vm794_vm4, %vm795_vm3 }
 0x597   : > { %v791_v28 = vsub.f32 1.0, %v790_v27 }
 0x599   : > { %v792_v29 = vmul.f32 %v1713_v25, %v791_v28 }
 0x59a   : > { %904 = vperm.xlu0 %1690, %v902_v26  }
 0x59b   : > { %v793_v30 = vadd.f32 %v1713_v25, %v792_v29  ;;  %v977_v29 = vstv %s976_s20 }
 0x59c   : > { %vm978_vm15 = vcmp.gt.s32.totalorder %v2213_v10, %v977_v29 }
 0x59d   : > { %v797_v33 = vsel %vm796_vm5, %v1713_v25, %v793_v30  ;;  %v979_v30 = vsel %vm978_vm15, 1, %v1976_v15 }
 0x59e   : > { %v802_v14 = vsel %vm799_vm6, %v801_v35, %v797_v33 }
 0x59f   : > { %v805_v40 = vmul.f32 %v802_v14, %v761_v39 }
 0x5fc   : > { %v808_v36 = vpop.permute.xlu0 %807 }
 0x5fd   : > { %v810_v38 = vmul.f32 %v808_v36, %v802_v14 }
 0x5ff   : > { %812 = vrot.lane.b32.xlu1 %v810_v38, %s1975_s16 }
 0x604   : > { %v2264_v44 = vpop.permute.xlu0 %827 }
 0x605   : > { %vm829_vm7 = vcmp.eq.s32.totalorder %v2264_v44, 1 }
 0x60c   : > { %v2279_v17 = vpop.permute.xlu0 %904 }
 0x60d   : > { %vm906_vm13 = vcmp.eq.s32.totalorder %v2279_v17, 1  ;;  %v672_v17 = vsel %vm671_vm8, %v2227_v37, 0.0 }
 0x671   : > { %v813_v41 = vpop.permute.xlu1 %812 }
 0x672   : > { %v815_v42 = vadd.f32 %v813_v41, %v805_v40 }
 0x674   : > { %1714 = vtanh.f32 %v815_v42  ;;  %v838_v8 = vsel %vm829_vm7, %v815_v42, %v761_v39 }
 0x67a   : > { %v1715_v43 = vpop.eup %1714 }
 0x67b   : > { %818 = vrot.lane.b32.xlu2 %v1715_v43, %s1974_s29 }
 0x6d5   : > { %v819_v45 = vpop.permute.xlu2 %818 }
 0x6d6   : > { %v2266_v46 = vmul.f32 %v819_v45, %v802_v14 }
 0x6d8   : > { %v837_v47 = vsel %vm829_vm7, %v2266_v46, %v760_v6 }
 0x6d9   : > { %v841_v48 = vpack.c.bf16 %v837_v47, %v837_v47 }
 0x6db   : > { %843 = vrot.lane.b32.xlu1 %v841_v48, %s1975_s16 }
 0x74d   : > { %v844_v49 = vpop.permute.xlu1 %843 }
 0x74e   : > { %1551 = vmatmul.msk.bf16.vlgmr.msrb.gmra.mxu0 %vm548_vm2, %v844_v49 }
 0x7cb   : > { %v857_v51 = vpop.f32.mrf.mxu0 }
 0x7cc   : > { %v861_v52 = vadd.f32 %v857_v51, %v840_v50 }
 0x7ce   : > { %1716 = vtanh.f32 %v861_v52  ;;  %v1552_v55 = vmul.f32 -1.442695, %v861_v52 }
 0x7d0   : > { %1718 = vpow2.f32 %v1552_v55 }
 0x7d3   : > { %v859_v53 = vpop.f32.mrf.mxu0 }
 0x7d4   : > { %v1717_v54 = vpop.eup %1716 }
 0x7d5   : > { %884 = vrot.lane.b32.xlu2 %v1717_v54, %s1974_s29 }
 0x7d6   : > { %v1719_v56 = vpop.eup %1718 }
 0x7d7   : > { %v865_v57 = vadd.f32 1.0, %v1719_v56 }
 0x7d9   : > { %1720 = vrcp.f32 %v865_v57  ;;  %v877_v63 = vand.u32 2147483648, %v865_v57  ;;  %vm871_vm10 = vweird.f32 %v865_v57  ;;  %v875_v0 = vand.u32 2147483647, %v865_v57 }
 0x7db   : > { %v878_v2 = vor.u32 1.1754944e-38, %v877_v63  ;;  %vm876_vm12 = vcmp.eq.f32.partialorder %v875_v0, 8.507059e+37 }
 0x7df   : > { %v1721_v58 = vpop.eup %1720 }
 0x7e0   : > { %v867_v59 = vmul.f32 %v1721_v58, %v865_v57  ;;  %vm872_vm9 = vweird.f32 %v1721_v58 }
 0x7e1   : > { %vm873_vm11 = vmor %vm871_vm10, %vm872_vm9 }
 0x7e2   : > { %v868_v60 = vsub.f32 1.0, %v867_v59 }
 0x7e4   : > { %v869_v61 = vmul.f32 %v1721_v58, %v868_v60  ;;  %v994_v60 = vld [vmem:[#allocation2 + $0xa] sm:$0x3] }
 0x7e6   : > { %v870_v62 = vadd.f32 %v1721_v58, %v869_v61 }
 0x7e8   : > { %v874_v1 = vsel %vm873_vm11, %v1721_v58, %v870_v62 }
 0x7e9   : > { %v879_v6 = vsel %vm876_vm12, %v878_v2, %v874_v1  ;;  %v1054_v1 = vstv %s1053_s8 }
 0x7ea   : > { %v882_v9 = vmul.f32 %v879_v6, %v838_v8  ;;  %vm1055_vm9 = vcmp.gt.s32.totalorder %v2213_v10, %v1054_v1 }
 0x7eb   : > { %v1056_v2 = vsel %vm1055_vm9, 1, %v1976_v15 }
 0x82f   : > { %v885_v4 = vpop.permute.xlu2 %884 }
 0x830   : > { %v887_v7 = vmul.f32 %v885_v4, %v879_v6 }
 0x832   : > { %889 = vrot.lane.b32.xlu1 %v887_v7, %s1975_s16 }
 0x8a4   : > { %v890_v11 = vpop.permute.xlu1 %889 }
 0x8a5   : > { %v892_v12 = vadd.f32 %v890_v11, %v882_v9 }
 0x8a7   : > { %1722 = vtanh.f32 %v892_v12  ;;  %v915_v49 = vsel %vm906_vm13, %v892_v12, %v838_v8 }
 0x8ad   : > { %v1723_v16 = vpop.eup %1722 }
 0x8ae   : > { %895 = vrot.lane.b32.xlu2 %v1723_v16, %s1974_s29 }
 0x908   : > { %v896_v18 = vpop.permute.xlu2 %895 }
 0x909   : > { %v2281_v19 = vmul.f32 %v896_v18, %v879_v6 }
 0x90b   : > { %v914_v20 = vsel %vm906_vm13, %v2281_v19, %v837_v47 }
 0x90c   : > { %v918_v21 = vpack.c.bf16 %v914_v20, %v914_v20 }
 0x90e   : > { %920 = vrot.lane.b32.xlu1 %v918_v21, %s1975_s16 }
 0x980   : > { %v921_v23 = vpop.permute.xlu1 %920 }
 0x981   : > { %1553 = vmatmul.msk.bf16.vlgmr.msrb.gmra.mxu1 %vm548_vm2, %v921_v23 }
 0x9fe   : > { %v934_v25 = vpop.f32.mrf.mxu1 }
 0x9ff   : > { %v938_v26 = vadd.f32 %v934_v25, %v917_v24 }
 0xa01   : > { %1724 = vtanh.f32 %v938_v26  ;;  %v1554_v31 = vmul.f32 -1.442695, %v938_v26 }
 0xa03   : > { %1726 = vpow2.f32 %v1554_v31 }
 0xa06   : > { %v936_v27 = vpop.f32.mrf.mxu1 }
 0xa07   : > { %v1725_v28 = vpop.eup %1724 }
 0xa08   : > { %961 = vrot.lane.b32.xlu2 %v1725_v28, %s1974_s29 }
 0xa09   : > { %v1727_v32 = vpop.eup %1726 }
 0xa0a   : > { %v942_v33 = vadd.f32 1.0, %v1727_v32 }
 0xa0c   : > { %1728 = vrcp.f32 %v942_v33  ;;  %v954_v40 = vand.u32 2147483648, %v942_v33  ;;  %vm948_vm3 = vweird.f32 %v942_v33  ;;  %v952_v41 = vand.u32 2147483647, %v942_v33 }
 0xa0e   : > { %v955_v43 = vor.u32 1.1754944e-38, %v954_v40  ;;  %vm953_vm5 = vcmp.eq.f32.partialorder %v952_v41, 8.507059e+37 }
 0xa10   : > { %981 = vperm.xlu2 %1688, %v979_v30  }
 0xa12   : > { %v1729_v35 = vpop.eup %1728 }
 0xa13   : > { %v944_v36 = vmul.f32 %v1729_v35, %v942_v33  ;;  %vm949_vm0 = vweird.f32 %v1729_v35 }
 0xa14   : > { %vm950_vm4 = vmor %vm948_vm3, %vm949_vm0 }
 0xa15   : > { %v945_v14 = vsub.f32 1.0, %v944_v36 }
 0xa17   : > { %v946_v38 = vmul.f32 %v1729_v35, %v945_v14 }
 0xa19   : > { %v947_v39 = vadd.f32 %v1729_v35, %v946_v38 }
 0xa1b   : > { %v951_v42 = vsel %vm950_vm4, %v1729_v35, %v947_v39  ;;  %v1071_v39 = vld [vmem:[#allocation2 + $0xc] sm:$0x3] }
 0xa1c   : > { %v956_v47 = vsel %vm953_vm5, %v955_v43, %v951_v42 }
 0xa1d   : > { %v959_v50 = vmul.f32 %v956_v47, %v915_v49 }
 0xa62   : > { %v962_v45 = vpop.permute.xlu2 %961 }
 0xa63   : > { %v964_v48 = vmul.f32 %v962_v45, %v956_v47  ;;  %v1131_v45 = vstv %s1130_s9 }
 0xa64   : > { %vm1132_vm3 = vcmp.gt.s32.totalorder %v2213_v10, %v1131_v45 }
 0xa65   : > { %966 = vrot.lane.b32.xlu0 %v964_v48, %s1975_s16 }
 0xa6a   : > { %v2297_v54 = vpop.permute.xlu2 %981 }
 0xa6b   : > { %vm983_vm6 = vcmp.eq.s32.totalorder %v2297_v54, 1 }
 0xad7   : > { %v967_v51 = vpop.permute.xlu0 %966 }
 0xad8   : > { %v969_v52 = vadd.f32 %v967_v51, %v959_v50 }
 0xada   : > { %1730 = vtanh.f32 %v969_v52  ;;  %v992_v27 = vsel %vm983_vm6, %v969_v52, %v915_v49 }
 0xae0   : > { %v1731_v53 = vpop.eup %1730 }
 0xae1   : > { %972 = vrot.lane.b32.xlu1 %v1731_v53, %s1974_s29 }
 0xb53   : > { %v973_v55 = vpop.permute.xlu1 %972 }
 0xb54   : > { %v2299_v56 = vmul.f32 %v973_v55, %v956_v47  ;;  %v1133_v47 = vsel %vm1132_vm3, 1, %v1976_v15 }
 0xb56   : > { %v991_v57 = vsel %vm983_vm6, %v2299_v56, %v914_v20 }
 0xb57   : > { %v995_v58 = vpack.c.bf16 %v991_v57, %v991_v57 }
 0xb59   : > { %997 = vrot.lane.b32.xlu0 %v995_v58, %s1975_s16 }
 0xbcb   : > { %v998_v59 = vpop.permute.xlu0 %997 }
 0xbcc   : > { %1555 = vmatmul.msk.bf16.vlgmr.msrb.gmra.mxu2 %vm548_vm2, %v998_v59 }
 0xc4f   : > { %v1011_v61 = vpop.f32.mrf.mxu2 }
 0xc50   : > { %v1015_v62 = vadd.f32 %v1011_v61, %v994_v60 }
 0xc52   : > { %1732 = vtanh.f32 %v1015_v62  ;;  %v1556_v4 = vmul.f32 -1.442695, %v1015_v62 }
 0xc54   : > { %1734 = vpow2.f32 %v1556_v4 }
 0xc57   : > { %v1013_v63 = vpop.f32.mrf.mxu2 }
 0xc58   : > { %v1733_v0 = vpop.eup %1732 }
 0xc59   : > { %1038 = vrot.lane.b32.xlu1 %v1733_v0, %s1974_s29 }
 0xc5a   : > { %v1735_v6 = vpop.eup %1734 }
 0xc5b   : > { %v1019_v7 = vadd.f32 1.0, %v1735_v6 }
 0xc5d   : > { %1736 = vrcp.f32 %v1019_v7  ;;  %v1031_v18 = vand.u32 2147483648, %v1019_v7  ;;  %vm1025_vm11 = vweird.f32 %v1019_v7  ;;  %v1029_v20 = vand.u32 2147483647, %v1019_v7 }
 0xc5f   : > { %v1032_v23 = vor.u32 1.1754944e-38, %v1031_v18  ;;  %vm1030_vm15 = vcmp.eq.f32.partialorder %v1029_v20, 8.507059e+37  ;;  %v1148_v20 = vld [vmem:[#allocation2 + $0xe] sm:$0x3] }
 0xc61   : > { %1058 = vperm.xlu1 %1689, %v1056_v2  }
 0xc63   : > { %v1737_v8 = vpop.eup %1736 }
 0xc64   : > { %v1021_v9 = vmul.f32 %v1737_v8, %v1019_v7  ;;  %vm1026_vm10 = vweird.f32 %v1737_v8 }
 0xc65   : > { %vm1027_vm12 = vmor %vm1025_vm11, %vm1026_vm10 }
 0xc66   : > { %v1022_v11 = vsub.f32 1.0, %v1021_v9 }
 0xc68   : > { %v1023_v12 = vmul.f32 %v1737_v8, %v1022_v11 }
 0xc6a   : > { %v1024_v16 = vadd.f32 %v1737_v8, %v1023_v12 }
 0xc6c   : > { %v1028_v21 = vsel %vm1027_vm12, %v1737_v8, %v1024_v16 }
 0xc6d   : > { %v1033_v25 = vsel %vm1030_vm15, %v1032_v23, %v1028_v21 }
 0xc6e   : > { %v1036_v28 = vmul.f32 %v1033_v25, %v992_v27 }
 0xccb   : > { %v1039_v24 = vpop.permute.xlu1 %1038 }
 0xccc   : > { %v1041_v26 = vmul.f32 %v1039_v24, %v1033_v25 }
 0xcce   : > { %1043 = vrot.lane.b32.xlu2 %v1041_v26, %s1975_s16  ;;  %v1208_v26 = vstv %s1207_s14 }
 0xccf   : > { %vm1209_vm12 = vcmp.gt.s32.totalorder %v2213_v10, %v1208_v26 }
 0xcd3   : > { %v2315_v32 = vpop.permute.xlu1 %1058 }
 0xcd4   : > { %vm1060_vm0 = vcmp.eq.s32.totalorder %v2315_v32, 1 }
 0xd28   : > { %v1044_v29 = vpop.permute.xlu2 %1043 }
 0xd29   : > { %v1046_v30 = vadd.f32 %v1044_v29, %v1036_v28  ;;  %v753_v28 = vsel %vm752_vm14, %v2245_v5, 0.0 }
 0xd2b   : > { %1738 = vtanh.f32 %v1046_v30  ;;  %v2332_v1 = vsel %vm1060_vm0, %v1046_v30, %v992_v27  ;;  %v1210_v27 = vsel %vm1209_vm12, 1, %v1976_v15 }
 0xd31   : > { %v1739_v31 = vpop.eup %1738 }
 0xd32   : > { %1049 = vrot.lane.b32.xlu0 %v1739_v31, %s1974_s29 }
 0xda4   : > { %v1050_v33 = vpop.permute.xlu0 %1049 }
 0xda5   : > { %v2317_v35 = vmul.f32 %v1050_v33, %v1033_v25 }
 0xda7   : > { %v1068_v36 = vsel %vm1060_vm0, %v2317_v35, %v991_v57  ;;  %v1061_v37 = vsel %vm1060_vm0, %v2317_v35, 0.0  ;;  %v984_v35 = vsel %vm983_vm6, %v2299_v56, 0.0 }
 0xda8   : > { %v1072_v14 = vpack.c.bf16 %v1068_v36, %v1068_v36 }
 0xdaa   : > { %1074 = vrot.lane.b32.xlu2 %v1072_v14, %s1975_s16 }
 0xe04   : > { %v1075_v38 = vpop.permute.xlu2 %1074 }
 0xe05   : > { %1557 = vmatmul.msk.bf16.vlgmr.msrb.gmra.mxu3 %vm548_vm2, %v1075_v38 }
 0xe88   : > { %v1088_v40 = vpop.f32.mrf.mxu3 }
 0xe89   : > { %v1092_v41 = vadd.f32 %v1088_v40, %v1071_v39 }
 0xe8b   : > { %1740 = vtanh.f32 %v1092_v41  ;;  %v1558_v48 = vmul.f32 -1.442695, %v1092_v41 }
 0xe8d   : > { %1742 = vpow2.f32 %v1558_v48 }
 0xe90   : > { %v1090_v42 = vpop.f32.mrf.mxu3 }
 0xe91   : > { %v1741_v43 = vpop.eup %1740 }
 0xe92   : > { %1115 = vrot.lane.b32.xlu0 %v1741_v43, %s1974_s29 }
 0xe93   : > { %v1743_v49 = vpop.eup %1742 }
 0xe94   : > { %v1096_v50 = vadd.f32 1.0, %v1743_v49  ;;  %v830_v49 = vsel %vm829_vm7, %v2266_v46, 0.0 }
 0xe96   : > { %1744 = vrcp.f32 %v1096_v50  ;;  %v1108_v58 = vand.u32 2147483648, %v1096_v50  ;;  %vm1102_vm5 = vweird.f32 %v1096_v50  ;;  %v1106_v59 = vand.u32 2147483647, %v1096_v50 }
 0xe98   : > { %v1109_v61 = vor.u32 1.1754944e-38, %v1108_v58  ;;  %vm1107_vm10 = vcmp.eq.f32.partialorder %v1106_v59, 8.507059e+37 }
 0xe9a   : > { %1135 = vperm.xlu0 %1690, %v1133_v47   ;;  %v907_v47 = vsel %vm906_vm13, %v2281_v19, 0.0 }
 0xe9c   : > { %v1745_v51 = vpop.eup %1744 }
 0xe9d   : > { %v1098_v52 = vmul.f32 %v1745_v51, %v1096_v50  ;;  %vm1103_vm4 = vweird.f32 %v1745_v51 }
 0xe9e   : > { %vm1104_vm9 = vmor %vm1102_vm5, %vm1103_vm4  ;;  %vm677_vm5 = vcmask 254976  }
 0xe9f   : > { %v1099_v53 = vsub.f32 1.0, %v1098_v52 }
 0xea1   : > { %v1100_v55 = vmul.f32 %v1745_v51, %v1099_v53 }
 0xea3   : > { %v1101_v57 = vadd.f32 %v1745_v51, %v1100_v55 }
 0xea5   : > { %v1105_v60 = vsel %vm1104_vm9, %v1745_v51, %v1101_v57 }
 0xea6   : > { %v1110_v63 = vsel %vm1107_vm10, %v1109_v61, %v1105_v60 }
 0xea7   : > { %v1113_v2 = vmul.f32 %v1110_v63, %v2332_v1 }
 0xf04   : > { %v1116_v62 = vpop.permute.xlu0 %1115 }
 0xf05   : > { %v1118_v0 = vmul.f32 %v1116_v62, %v1110_v63 }
 0xf07   : > { %1120 = vrot.lane.b32.xlu1 %v1118_v0, %s1975_s16 }
 0xf0c   : > { %v1136_v8 = vpop.permute.xlu0 %1135 }
 0xf0d   : > { %vm1137_vm11 = vcmp.eq.s32.totalorder %v1136_v8, 1 }
 0xf79   : > { %v1121_v4 = vpop.permute.xlu1 %1120 }
 0xf7a   : > { %v2335_v6 = vadd.f32 %v1121_v4, %v1113_v2 }
 0xf7c   : > { %1746 = vtanh.f32 %v2335_v6  ;;  %v1146_v19 = vsel %vm1137_vm11, %v2335_v6, %v2332_v1 }
 0xf82   : > { %v1747_v7 = vpop.eup %1746 }
 0xf83   : > { %1126 = vrot.lane.b32.xlu2 %v1747_v7, %s1974_s29 }
 0xfdd   : > { %v1127_v9 = vpop.permute.xlu2 %1126 }
 0xfde   : > { %v1129_v11 = vmul.f32 %v1127_v9, %v1110_v63 }
 0xfe0   : > { %v2340_v12 = vsel %vm1137_vm11, %v1129_v11, %v1068_v36  ;;  %v1138_v29 = vsel %vm1137_vm11, %v1129_v11, 0.0 }
 0xfe1   : > { %v1149_v16 = vpack.c.bf16 %v2340_v12, %v2340_v12 }
 0xfe3   : > { %1151 = vrot.lane.b32.xlu1 %v1149_v16, %s1975_s16 }
0x1055   : > { %v1152_v18 = vpop.permute.xlu1 %1151 }
0x1056   : > { %1559 = vmatmul.msk.bf16.vlgmr.msra.gmra.mxu0 %vm548_vm2, %v1152_v18 }
0x10d3   : > { %v1165_v21 = vpop.f32.mrf.mxu0 }
0x10d4   : > { %v1169_v23 = vadd.f32 %v1165_v21, %v1148_v20 }
0x10d6   : > { %1748 = vtanh.f32 %v1169_v23  ;;  %v1560_v30 = vmul.f32 -1.442695, %v1169_v23 }
0x10d8   : > { %1750 = vpow2.f32 %v1560_v30 }
0x10db   : > { %v1167_v24 = vpop.f32.mrf.mxu0 }
0x10dc   : > { %v1749_v25 = vpop.eup %1748 }
0x10dd   : > { %1192 = vrot.lane.b32.xlu2 %v1749_v25, %s1974_s29 }
0x10de   : > { %v1751_v31 = vpop.eup %1750 }
0x10df   : > { %v1173_v33 = vadd.f32 1.0, %v1751_v31 }
0x10e1   : > { %1752 = vrcp.f32 %v1173_v33  ;;  %v1185_v39 = vand.u32 2147483648, %v1173_v33  ;;  %vm1179_vm3 = vweird.f32 %v1173_v33  ;;  %v1183_v3 = vand.u32 2147483647, %v1173_v33 }
0x10e3   : > { %v1186_v40 = vor.u32 1.1754944e-38, %v1185_v39  ;;  %vm1184_vm4 = vcmp.eq.f32.partialorder %v1183_v3, 8.507059e+37 }
0x10e5   : > { %1212 = vperm.xlu2 %1688, %v1210_v27  }
0x10e7   : > { %v1753_v36 = vpop.eup %1752 }
0x10e8   : > { %v1175_v10 = vmul.f32 %v1753_v36, %v1173_v33  ;;  %vm1180_vm15 = vweird.f32 %v1753_v36 }
0x10e9   : > { %vm1181_vm14 = vmor %vm1179_vm3, %vm1180_vm15 }
0x10ea   : > { %v1176_v14 = vsub.f32 1.0, %v1175_v10 }
0x10ec   : > { %v1177_v15 = vmul.f32 %v1753_v36, %v1176_v14 }
0x10ed   : > { %755 = vrot.lane.b32.xlu2 %v753_v28, %s1975_s16 }
0x10ee   : > { %v1178_v38 = vadd.f32 %v1753_v36, %v1177_v15 }
0x10f0   : > { %v1182_v5 = vsel %vm1181_vm14, %v1753_v36, %v1178_v38 }
0x10f1   : > { %v1187_v42 = vsel %vm1184_vm4, %v1186_v40, %v1182_v5 }
0x10f2   : > { %v1190_v51 = vmul.f32 %v1187_v42, %v1146_v19 }
0x10f5   : > { %1140 = vrot.lane.b32.xlu2 %v1138_v29, %s1975_s16 }
0x1137   : > { %v1193_v41 = vpop.permute.xlu2 %1192 }
0x1138   : > { %v1195_v43 = vmul.f32 %v1193_v41, %v1187_v42 }
0x113a   : > { %1197 = vrot.lane.b32.xlu0 %v1195_v43, %s1975_s16 }
0x113f   : > { %v1213_v45 = vpop.permute.xlu2 %1212 }
0x1140   : > { %vm1214_vm13 = vcmp.eq.s32.totalorder %v1213_v45, 1 }
0x1142   : > { %909 = vrot.lane.b32.xlu0 %v907_v47, %s1975_s16 }
0x1147   : > { %v756_v48 = vpop.permute.xlu2 %755 }
0x1148   : > { %759 = vst.msk [vmem:[#allocation3 + $0x2] sm:$0x3] %vm677_vm5, %v756_v48 }
0x114a   : > { %832 = vrot.lane.b32.xlu0 %v830_v49, %s1975_s16 }
0x114f   : > { %v1141_v50 = vpop.permute.xlu2 %1140  ;;  %v1235_v6 = vld [vmem:[#allocation3 + $0x2] sm:$0x3] }
0x1150   : > { %1144 = vst.msk [vmem:[#allocation3 + $0xc] sm:$0x3] %vm677_vm5, %v1141_v50 }
0x1152   : > { %674 = vrot.lane.b32.xlu0 %v672_v17, %s1975_s16 }
0x1157   : > { %v1240_v23 = vld [vmem:[#allocation3 + $0xc] sm:$0x3] }
0x1158   : > { %v1254_v27 = vrot.slane %v1240_v23, 4 }
0x11ac   : > { %v1198_v52 = vpop.permute.xlu0 %1197 }
0x11ad   : > { %v1200_v53 = vadd.f32 %v1198_v52, %v1190_v51 }
0x11af   : > { %1754 = vtanh.f32 %v1200_v53  ;;  %v1223_v44 = vsel %vm1214_vm13, %v1200_v53, %v1146_v19 }
0x11b0   : > { %1230 = vrot.lane.b32.xlu0 %v1223_v44, %s1977_s28 }
0x11b4   : > { %v910_v46 = vpop.permute.xlu0 %909 }
0x11b5   : > { %v1755_v55 = vpop.eup %1754  ;;  %913 = vst.msk [vmem:[#allocation3 + $0x6] sm:$0x3] %vm677_vm5, %v910_v46 }
0x11b6   : > { %1203 = vrot.lane.b32.xlu1 %v1755_v55, %s1974_s29 }
0x11bc   : > { %v833_v34 = vpop.permute.xlu0 %832  ;;  %v1237_v0 = vld [vmem:[#allocation3 + $0x6] sm:$0x3] }
0x11bd   : > { %836 = vst.msk [vmem:[#allocation3 + $0x4] sm:$0x3] %vm677_vm5, %v833_v34  ;;  %v1248_v2 = vrot.slane %v1237_v0, 4 }
0x11be   : > { %1063 = vrot.lane.b32.xlu1 %v1061_v37, %s1975_s16 }
0x11bf   : > { %v1249_v8 = vsel %vm426_vm1, %v1248_v2, %v1235_v6 }
0x11c0   : > { %v1253_v54 = vperm.slane %v1249_v8, %v2159_v13 }
0x11c2   : > { %v1266_v24 = vrot.slane %v1253_v54, 4 }
0x11c4   : > { %v675_v57 = vpop.permute.xlu0 %674  ;;  %v1236_v4 = vld [vmem:[#allocation3 + $0x4] sm:$0x3] }
0x11c5   : > { %678 = vst.msk [vmem:[#allocation3] sm:$0x3] %vm677_vm5, %v675_v57  ;;  %v1242_v9 = vrot.slane %v1236_v4, 4 }
0x11cc   : > { %v1234_v7 = vld [vmem:[#allocation3] sm:$0x3] }
0x11cd   : > { %v1243_v11 = vsel %vm426_vm1, %v1242_v9, %v1234_v7 }
0x11ce   : > { %v1247_v18 = vperm.slane %v1243_v11, %v2159_v13 }
0x11d0   : > { %v1267_v25 = vsel %vm426_vm1, %v1266_v24, %v1247_v18 }
0x11d1   : > { %v1271_v29 = vperm.slane %v1267_v25, %v2174_v22 }
0x11d3   : > { %v1280_v10 = vrot.slane %v1271_v29, 4 }
0x1222   : > { %v1231_v58 = vpop.permute.xlu0 %1230 }
0x1223   : > { %1233 = vst.msk [vmem:[#allocation5] sm:$0x3] %vm677_vm5, %v1231_v58 }
0x1228   : > { %v1204_v59 = vpop.permute.xlu1 %1203 }
0x1229   : > { %v1206_v60 = vmul.f32 %v1204_v59, %v1187_v42 }
0x122b   : > { %v1222_v61 = vsel %vm1214_vm13, %v1206_v60, %v2340_v12  ;;  %v1215_v62 = vsel %vm1214_vm13, %v1206_v60, 0.0 }
0x122c   : > { %1225 = vrot.lane.b32.xlu2 %v1222_v61, %s1975_s16  ;;  %1217 = vrot.lane.b32.xlu1 %v1215_v62, %s1975_s16 }
0x1230   : > { %v1064_v32 = vpop.permute.xlu1 %1063 }
0x1231   : > { %1067 = vst.msk [vmem:[#allocation3 + $0xa] sm:$0x3] %vm677_vm5, %v1064_v32 }
0x1234   : > { %986 = vrot.lane.b32.xlu1 %v984_v35, %s1975_s16 }
0x1238   : > { %v1239_v20 = vld [vmem:[#allocation3 + $0xa] sm:$0x3] }
0x1286   : > { %v1226_v63 = vpop.permute.xlu2 %1225 }
0x1287   : > { %1228 = vst.msk [vmem:[#allocation4] sm:$0x3] %vm677_vm5, %v1226_v63 }
0x129e   : > { %v1218_v1 = vpop.permute.xlu1 %1217 }
0x129f   : > { %1221 = vst.msk [vmem:[#allocation3 + $0xe] sm:$0x3] %vm677_vm5, %v1218_v1 }
0x12a6   : > { %v1241_v56 = vld [vmem:[#allocation3 + $0xe] sm:$0x3]  ;;  %v987_v12 = vpop.permute.xlu1 %986 }
0x12a7   : > { %v1260_v16 = vrot.slane %v1241_v56, 4  ;;  %990 = vst.msk [vmem:[#allocation3 + $0x8] sm:$0x3] %vm677_vm5, %v987_v12 }
0x12a9   : > { %v1261_v21 = vsel %vm426_vm1, %v1260_v16, %v1239_v20 }
0x12aa   : > { %v1265_v26 = vperm.slane %v1261_v21, %v2159_v13 }
0x12ac   : > { %v1272_v31 = vrot.slane %v1265_v26, 4 }
0x12ae   : > { %v1238_v28 = vld [vmem:[#allocation3 + $0x8] sm:$0x3] }
0x12af   : > { %v1255_v30 = vsel %vm426_vm1, %v1254_v27, %v1238_v28 }
0x12b0   : > { %v1259_v33 = vperm.slane %v1255_v30, %v2159_v13 }
0x12b2   : > { %v1273_v36 = vsel %vm426_vm1, %v1272_v31, %v1259_v33 }
0x12b3   : > { %v1277_v14 = vperm.slane %v1273_v36, %v2174_v22 }
0x12b4   : > { %1287 = sbr.rel (%p1561_p1) target bundleno = 5044 (0x13b4), region = 64 }
0x12b5   : > { %v1278_v15 = vrot.slane %v1277_v14, 4  ;;  %v1281_v38 = vsel %vm426_vm1, %v1277_v14, %v1280_v10 }
0x12b6   : > { %1283 = vst.msk [vmem:[%s2145_s7 + $0x8] sm:$0xff] %vm548_vm2, %v1281_v38 }
0x12b7   : > { %v1279_v39 = vsel %vm426_vm1, %v1278_v15, %v1271_v29 }
0x12b8   : > { %1282 = vst.msk [vmem:[%s2145_s7] sm:$0xff] %vm548_vm2, %v1279_v39 }
0x12b9   : > { %1288 = vst.msk [vmem:[#allocation12] sm:$0x3] %vm677_vm5, %v1226_v63  ;;  %v1289_v13 = vpack.c.bf16 %v1222_v61, %v1222_v61  ;;  %v1584_v3 = vld [vmem:[%s2486_s5 + $0x8] sm:$0xff]  ;;  %v1583_v22 = vld [vmem:[%s2486_s5] sm:$0xff]  ;;  %vm1329_vm1 = vcmask 74752  }
0x12ba   : > { %1322 = vmatpush.bf16.msra.mxu0 %v1584_v3  ;;  %v1756_v40 = vld [vmem:[%s2487_s6] ss:$0 sm:$0xff] }
0x12bb   : > { %1299 = vrot.lane.b32.xlu0 %v1289_v13, %s1978_s24 }
0x12be   : > { %1323 = vmatpush.bf16.msra.mxu0 %v1583_v22 }
0x132d   : > { %v1300_v5 = vpop.permute.xlu0 %1299 }
0x132e   : > { %1570 = vmatmul.msk.bf16.vlgmr.msra.gmra.mxu0 %vm548_vm2, %v1300_v5 }
0x13ab   : > { %v1325_v41 = vpop.f32.mrf.mxu0 }
0x13ac   : > { %v1326_v42 = vadd.f32 %v1756_v40, %v1325_v41 }
0x13ae   : > { %1330 = vst.msk [vmem:[#allocation14] sm:$0x3] %vm1329_vm1, %v1326_v42 }
0x13b3   : > { %v1327_v43 = vpop.f32.mrf.mxu0 }
0x13b4 PF: > { %s1979_s27 = smov [#allocation12]   ;;  %s2513_s30 = sld [smem:[#allocation25_spill]] }
0x13b5   : > { %s1363_s28 = sshll.u32 %s1979_s27, 4  ;;  %s2514_s14 = sld [smem:[#allocation24_spill]]  ;;  %s1364_s28 = int_to_ptr.vmem [resolvable:$true] %s1363_s28 }
0x13b6   : > { %s1346_s24 = sshll.u32 %s2145_s7, 4  ;;  %s1332_s16 = scalar_lea.sflag [#allocation8], %s2133_s15  ;;  %s1347_s24 = int_to_ptr.vmem [resolvable:$true] %s1346_s24 }
0x13ba   : > { %s1365_s20 = sshll.u32 %s2513_s30, 4  ;;  %s1366_s20 = int_to_ptr.hbm [resolvable:$true] %s1365_s20 }
0x13bb   : > { %1593 = dma.vmem_to_hbm [thread:$0]  (%p2072_p2), %s1364_s28, 32, %s1366_s20, [#allocation13]  }
0x13bc   : > { %s2515_s17 = smov %s2514_s14  ;;  %s1345_s19 = scalar_lea.hbm %s2514_s14, %s2208_s23 }
0x13bd   : > { %s1348_s29 = sshll.u32 %s1345_s19, 4  ;;  %s1865_s28 = scalar_lea.hbm %s2515_s17, 32  ;;  %s1349_s29 = int_to_ptr.hbm [resolvable:$true] %s1348_s29 }
0x13be   : > { %s1859_s12 = sshra.s32 %s1349_s29, 4  ;;  %s1860_s12 = int_to_ptr.hbm [resolvable:$true] %s1859_s12 }
0x13bf   : > { %s1861_s25 = scalar_lea.hbm %s1860_s12, 16  ;;  %p1866_p0 = scmp.lt.s32.totalorder %s1860_s12, %s2515_s17 }
0x13c0   : > { %p1862_p4 = scmp.ne.s32.totalorder %s1860_s12, %s1861_s25  ;;  %p1867_p3 = scmp.lt.s32.totalorder %s1865_s28, %s1861_s25 }
0x13c2   : > { %p1863_p12 = pnand %p1862_p4, %p2113_p5  ;;  %p1868_p7 = por %p1867_p3, %p1866_p0 }
0x13c4   : > { %p1864_p13 = pneg %p1863_p12 }
0x13c6   : > { %p1869_p9 = pnand %p1868_p7, %p1864_p13 }
0x13c8   : > { %1872 = shalt.err (!%p1869_p9)
}
0x13c9   : > { %s1980_s15 = smov 128   ;;  %s1981_s7 = smov 256  }
0x13ca   : > { %s1982_s23 = smov 8   ;;  %s1983_s20 = smov [#allocation14]  }
0x13cb   : > { %1591 = dma.vmem_to_hbm [thread:$0]  (%p2113_p5), %s1347_s24, 256, %s1349_s29, %s1332_s16, %s1980_s15, %s1981_s7, %s1982_s23  }
0x13cc   : > { %s1377_s8 = sshll.u32 %s1983_s20, 4  ;;  %s2516_s19 = sld [smem:[#allocation26_spill]]  ;;  %s1378_s8 = int_to_ptr.vmem [resolvable:$true] %s1377_s8 }
0x13d2   : > { %s1379_s27 = sshll.u32 %s2516_s19, 4  ;;  %s1380_s27 = int_to_ptr.hbm [resolvable:$true] %s1379_s27 }
0x13d3   : > { %1595 = dma.vmem_to_hbm [thread:$0]  (%p2072_p2), %s1378_s8, 32, %s1380_s27, [#allocation13]  }
0x13d4   : > { %1934 = dma.done.wait (%p2072_p2), [#allocation13], 64  }
0x13d5   : > { %1936 = vsyncadd (%p2072_p2), [#allocation13], 4294967232 }
0x13d6 PF: > { %s2517_s12 = sld [smem:[#allocation19_spill]]  ;;  %p1610_p5 = pnand %p1519_p11, %p2083_p6 }
0x13d7   : > { %s2519_s21 = sld [smem:[#allocation20_spill]] }
0x13d8   : > { %p1611_p10 = pneg %p1610_p5 }
0x13dc   : > { %s1401_s24 = sand.u32 1, %s2517_s12  }
0x13dd   : > { %s1402_s29 = scalar_lea.sflag [#allocation8], %s1401_s24 }
0x13de   : > { %1938 = dma.done.wait (%p1611_p10), %s1402_s29, 256  }
0x13df   : > { %1940 = vsyncadd (%p1611_p10), %s1402_s29, 4294967040  ;;  %s28_s14 = sadd.s32 1, %s2519_s21   ;;  %s2520_s18 = sld [smem:[#allocation22_spill]] }
0x13e0   : > { %p25_p8 = scmp.ge.s32.totalorder %s28_s14, 4   ;;  %s2521_s30 = smov %s1947_s10 }
0x13e1   : > { %s2522_s10 = smov %s1951_s11  ;;  %s2523_s11 = smov %s2122_s26 }
0x13e2   : > { %s2524_s12 = smov %s1959_s13  ;;  %27 = sbr.rel (!%p25_p8) target bundleno = 13 (0xd), region = 154 }
0x13e5   : > { %s2525_s13 = smov %s2520_s18 }
0x13e7   :  { %1408 = vsyncpa [#allocation7], 1 }
0x13e8   :  { %1410 = vsyncpa [#allocation7 + $0x1], 1 }
0x13e9   :  { %1411 = vsyncpa [#allocation10], 1 }
0x13ea   :  { %1412 = vsyncpa [#allocation8], 1 }
0x13eb   :  { %1414 = vsyncpa [#allocation8 + $0x1], 1 }
0x13ec   :  { %1415 = vsyncpa [#allocation13], 1 }

</bundles_post_ra>
